<compile_context>
chip_gen: v7x
topology: tpu7x:2x2x1
jax: 0.10.0
libtpu: 0.0.40
codegen_flags: <defaults>
</compile_context>

<pallas_src>
import math
import functools

import jax
import jax.numpy as jnp
from jax import lax
from jax.experimental import pallas as pl
from jax.experimental.pallas import tpu as pltpu


# ----------------------------- in-kernel helpers -----------------------------

def _gelu(x):
    # matches the torch `gelu` in the module (tanh approximation)
    return 0.5 * x * (1.0 + jnp.tanh(math.sqrt(2.0 / math.pi) * (x + 0.044715 * x ** 3)))


def _layer_norm(x, g, b, eps=1e-6):
    mu = jnp.mean(x, axis=-1, keepdims=True)
    var = jnp.mean((x - mu) ** 2, axis=-1, keepdims=True)
    return (x - mu) * jax.lax.rsqrt(var + eps) * g + b


# --------------------------------- kernel ------------------------------------

def encoder_layer_kernel(xq_ref, xf_ref, bias_ref,
                         ln1_g_ref, ln1_b_ref,
                         wq_ref, bq_ref, wk_ref, bk_ref, wv_ref, bv_ref,
                         wo_ref, bo_ref,
                         ln2_g_ref, ln2_b_ref,
                         w1_ref, b1_ref, w2_ref, b2_ref,
                         out_ref, k_sc, v_sc,
                         *, heads, apply_pre_ln, compute_dtype, kv_block, f_block):
    f32 = jnp.float32
    cd = compute_dtype
    qi = pl.program_id(1)

    _, TQ, D = xq_ref.shape
    dh = D // heads
    num_kb = k_sc.shape[0]

    # ---- K/V cache: LN(inputs) + K/V projections computed once per batch element ----
    @pl.when(qi == 0)
    def _():
        xf = xf_ref[0].astype(f32)                                   # (S, D)
        if apply_pre_ln:
            xf = _layer_norm(xf, ln1_g_ref[...], ln1_b_ref[...])
        xf_c = xf.astype(cd)
        k = jnp.dot(xf_c, wk_ref[...], preferred_element_type=f32) + bk_ref[...]
        v = jnp.dot(xf_c, wv_ref[...], preferred_element_type=f32) + bv_ref[...]
        k_sc[...] = k.astype(cd).reshape(num_kb, kv_block, D)
        v_sc[...] = v.astype(cd).reshape(num_kb, kv_block, D)

    # ---- query tile ----
    xq = xq_ref[0].astype(f32)                                       # (TQ, D)
    xq_n = _layer_norm(xq, ln1_g_ref[...], ln1_b_ref[...]) if apply_pre_ln else xq
    # 1/sqrt(dh) attention scale is already folded into wq/bq by prepare_params().
    q = jnp.dot(xq_n.astype(cd), wq_ref[...], preferred_element_type=f32) + bq_ref[...]
    qh = q.reshape(TQ, heads, dh).astype(cd)                         # (TQ, H, dh)

    # ---- flash-style streaming over key blocks with an online softmax ----
    def kv_step(kb, carry):
        m, l, acc = carry
        kblk = k_sc[kb].reshape(kv_block, heads, dh)                 # (KB, H, dh)
        vblk = v_sc[kb].reshape(kv_block, heads, dh)
        s = jnp.einsum('qhd,khd->hqk', qh, kblk,
                       preferred_element_type=f32)                   # (H, TQ, KB)
        # additive mask bias (adding -1e18 in f32 matches masked_fill(-1e18) by rounding)
        s = s + bias_ref[0, kb][None, :, :]
        m_new = jnp.maximum(m, jnp.max(s, axis=-1, keepdims=True))
        alpha = jnp.exp(m - m_new)
        p = jnp.exp(s - m_new)
        l = alpha * l + jnp.sum(p, axis=-1, keepdims=True)
        acc = alpha * acc + jnp.einsum('hqk,khd->hqd', p.astype(cd), vblk,
                                       preferred_element_type=f32)
        return m_new, l, acc

    init = (jnp.full((heads, TQ, 1), -jnp.inf, f32),
            jnp.zeros((heads, TQ, 1), f32),
            jnp.zeros((heads, TQ, dh), f32))
    if num_kb == 1:
        _, l, acc = kv_step(0, init)
    else:
        _, l, acc = lax.fori_loop(0, num_kb, kv_step, init)

    # fully-masked rows yield a uniform distribution (same as the torch masked_fill ref)
    ctx = acc * pl.reciprocal(l, approx=True)                        # (H, TQ, dh)
    ctx = jnp.transpose(ctx, (1, 0, 2)).reshape(TQ, D)               # (TQ, D)
    attn = jnp.dot(ctx.astype(cd), wo_ref[...], preferred_element_type=f32) + bo_ref[...]
    out1 = attn + xq                                                 # dropout == identity

    # ---- PositionwiseFeedForward (pre-LN, gelu, residual), tiled over d_ff ----
    h1 = _layer_norm(out1, ln2_g_ref[...], ln2_b_ref[...]).astype(cd)
    F = w1_ref.shape[1]
    num_fb = F // f_block
    ffn = jnp.zeros((TQ, D), f32)
    for fb in range(num_fb):                                         # static chunk loop
        lo = fb * f_block
        inter = _gelu(jnp.dot(h1, w1_ref[:, lo:lo + f_block],
                              preferred_element_type=f32) + b1_ref[:, lo:lo + f_block])
        ffn = ffn + jnp.dot(inter.astype(cd), w2_ref[lo:lo + f_block, :],
                            preferred_element_type=f32)
    out_ref[0] = (ffn + b2_ref[...] + out1).astype(out_ref.dtype)


# ------------------------------ wrapper helpers -------------------------------

def _tpu_vmem_capacity_bytes(default=128 * 1024 * 1024):
    try:
        info = pltpu.get_tpu_info()
        return int(getattr(info, "vmem_capacity_bytes", default))
    except Exception:
        return default


def _vmem_limit_bytes(cap):
    # Leave headroom for compiler scratch / semaphores / pipeline internals:
    # ~48 MiB on v7x (64 MiB physical), ~96 MiB on v5e/v6e (128 MiB physical).
    return min(int(cap * 3 // 4), 100 * 1024 * 1024)


def _choose_block(total, target, quantum):
    """Largest divisor of `total` that is <= target and a multiple of `quantum`
    (falls back to `total` itself, which is always a legal full-dim block)."""
    if total <= target:
        return total
    best = None
    b = quantum
    while b <= target:
        if total % b == 0:
            best = b
        b += quantum
    return best if best is not None else total


def prepare_params(params, heads, compute_dtype=jnp.float32):
    """One-time parameter transform (call once, NOT per layer invocation):
       * fold the 1/sqrt(dh) attention scale into wq / bq
       * cast matmul weights to the MXU operand dtype (compute_dtype)
       LayerNorm params and all biases stay float32 (f32 accumulation in-kernel)."""
    (ln1_g, ln1_b, wq, bq, wk, bk, wv, bv, wo, bo,
     ln2_g, ln2_b, w1, b1, w2, b2) = params
    D = wq.shape[0]
    scale = 1.0 / math.sqrt(D // heads)
    cd, f32 = compute_dtype, jnp.float32
    return [ln1_g.astype(f32), ln1_b.astype(f32),
            (wq * scale).astype(cd), (bq * scale).astype(f32),
            wk.astype(cd), bk.astype(f32),
            wv.astype(cd), bv.astype(f32),
            wo.astype(cd), bo.astype(f32),
            ln2_g.astype(f32), ln2_b.astype(f32),
            w1.astype(cd), b1.astype(f32),
            w2.astype(cd), b2.astype(f32)]


# --------------------------------- wrapper -----------------------------------

def transformer_encoder_layer(it, inputs, mask, params, heads, *,
                              q_tile=None, kv_block=None, f_block=None):
    """params: output of prepare_params() (weights already scaled / cast)."""
    B, S, D = inputs.shape
    assert D % heads == 0
    cd = params[2].dtype                       # MXU operand dtype (wq dtype)
    vmem_cap = _tpu_vmem_capacity_bytes()

    if q_tile is None:
        # v7x (64 MiB VMEM): cap TQ at 128; v5e/v6e: 256.
        q_tile = _choose_block(S, 128 if vmem_cap <= 64 * 1024 * 1024 else 256, 8)
        # give the software pipeline (and v7x's 2nd TensorCore) >= 4 grid steps
        while B * (S // q_tile) < 4 and q_tile % 16 == 0:
            q_tile //= 2
    assert S % q_tile == 0 and (q_tile == S or q_tile % 8 == 0)
    nq = S // q_tile

    if kv_block is None:
        kv_block = _choose_block(S, 512, 8)
    assert S % kv_block == 0
    num_kb = S // kv_block

    F = params[12].shape[1]                    # d_ff (w1: (D, F))
    if f_block is None:
        f_block = _choose_block(F, 512, 128) if F >= 128 else F
    assert F % f_block == 0

    # additive attention bias, pre-blocked for the in-kernel key-streaming loop
    attn_bias = jnp.where(mask > 0.5, -1e18, 0.0).astype(jnp.float32)
    attn_bias = attn_bias.reshape(B, num_kb, 1, kv_block)

    kern = functools.partial(encoder_layer_kernel, heads=heads,
                             apply_pre_ln=(it != 0), compute_dtype=cd,
                             kv_block=kv_block, f_block=f_block)

    # Constant-index blocks are single-buffered: default double-buffering would
    # reserve two copies of the full weight set even though the block index never
    # changes (Pallas skips the re-DMA but still allocates both buffers).
    def const_spec(p):
        nd = p.ndim
        return pl.BlockSpec(p.shape, lambda b, qi, _nd=nd: (0,) * _nd,
                            pipeline_mode=pl.Buffered(1))

    in_specs = [
        pl.BlockSpec((1, q_tile, D), lambda b, qi: (b, qi, 0)),        # query tile
        pl.BlockSpec((1, S, D),      lambda b, qi: (b, 0, 0)),         # full seq (K/V src)
        pl.BlockSpec((1, num_kb, 1, kv_block), lambda b, qi: (b, 0, 0, 0),
                     pipeline_mode=pl.Buffered(1)),                    # mask bias
    ] + [const_spec(p) for p in params]

    return pl.pallas_call(
        kern,
        out_shape=jax.ShapeDtypeStruct((B, S, D), inputs.dtype),
        grid=(B, nq),
        in_specs=in_specs,
        out_specs=pl.BlockSpec((1, q_tile, D), lambda b, qi: (b, qi, 0)),
        scratch_shapes=[pltpu.VMEM((num_kb, kv_block, D), cd),          # K cache
                        pltpu.VMEM((num_kb, kv_block, D), cd)],         # V cache
        compiler_params=pltpu.CompilerParams(
            # qi is 'arbitrary' so the K/V scratch written at qi==0 is carried across
            # query tiles; batch stays 'parallel' for v7x megacore sharding.
            dimension_semantics=("parallel", "arbitrary"),
            vmem_limit_bytes=_vmem_limit_bytes(vmem_cap)),
    )(inputs, inputs, attn_bias, *params)


# ----------------------------- pure-JAX reference ----------------------------

def reference_layer(it, x, mask, params, heads):
    (ln1_g, ln1_b, wq, bq, wk, bk, wv, bv, wo, bo,
     ln2_g, ln2_b, w1, b1, w2, b2) = params
    B, S, D = x.shape
    dh = D // heads

    def ln(z, g, b):
        mu = jnp.mean(z, -1, keepdims=True)
        var = jnp.mean((z - mu) ** 2, -1, keepdims=True)
        return (z - mu) / jnp.sqrt(var + 1e-6) * g + b

    xn = ln(x, ln1_g, ln1_b) if it != 0 else x
    q = xn @ wq + bq
    k = xn @ wk + bk
    v = xn @ wv + bv
    qh = q.reshape(B, S, heads, dh).transpose(0, 2, 1, 3) / math.sqrt(dh)
    kh = k.reshape(B, S, heads, dh).transpose(0, 2, 1, 3)
    vh = v.reshape(B, S, heads, dh).transpose(0, 2, 1, 3)
    s = jnp.einsum('bhqd,bhkd->bhqk', qh, kh)
    s = jnp.where(mask[:, None, :, :] > 0.5, -1e18, s)
    p = jax.nn.softmax(s, axis=-1)
    ctx = jnp.einsum('bhqk,bhkd->bhqd', p, vh).transpose(0, 2, 1, 3).reshape(B, S, D)
    attn_out = ctx @ wo + bo
    out1 = attn_out + x
    h1 = ln(out1, ln2_g, ln2_b)
    pre = h1 @ w1 + b1
    inter = 0.5 * pre * (1 + jnp.tanh(math.sqrt(2 / math.pi) * (pre + 0.044715 * pre ** 3)))
    return inter @ w2 + b2 + out1


# ------------------------------------ main ------------------------------------

if __name__ == "__main__":
    B, S, D, H, F = 2, 16, 32, 4, 256   # batch, seq, d_model, heads, d_ff
    key = jax.random.PRNGKey(0)
    ks = jax.random.split(key, 12)

    def w(k, shape):
        return jax.random.normal(k, shape, jnp.float32) * 0.02

    # parameters (deterministic synthetic init); weights stored as (in, out)
    ln1_g = jnp.ones((1, D), jnp.float32)
    ln1_b = jnp.zeros((1, D), jnp.float32)
    wq, bq = w(ks[0], (D, D)), jnp.zeros((1, D), jnp.float32)
    wk, bk = w(ks[1], (D, D)), jnp.zeros((1, D), jnp.float32)
    wv, bv = w(ks[2], (D, D)), jnp.zeros((1, D), jnp.float32)
    wo, bo = w(ks[3], (D, D)), w(ks[4], (1, D))
    ln2_g = jnp.ones((1, D), jnp.float32)
    ln2_b = jnp.zeros((1, D), jnp.float32)
    w1, b1 = w(ks[5], (D, F)), w(ks[6], (1, F))
    w2, b2 = w(ks[7], (F, D)), w(ks[8], (1, D))
    params = [ln1_g, ln1_b, wq, bq, wk, bk, wv, bv, wo, bo,
              ln2_g, ln2_b, w1, b1, w2, b2]

    inputs = jax.random.normal(ks[9], (B, S, D), jnp.float32)
    # mask: 1.0 = padding / masked.  batch0 keeps 10 tokens, batch1 keeps 16.
    valid = jnp.array([10, 16])
    mask = (jnp.arange(S)[None, :] >= valid[:, None]).astype(jnp.float32)[:, None, :]

    # one-time parameter prep (scale folding + dtype cast) -- outside the hot path
    p_f32 = prepare_params(params, H, jnp.float32)
    p_bf16 = prepare_params(params, H, jnp.bfloat16)

    ref1 = reference_layer(1, inputs, mask, params, H)
    ref0 = reference_layer(0, inputs, mask, params, H)

    # --- iter != 0, f32, explicit small tiles so the K/V cache, the key-streaming
    #     loop (num_kb=2) and the FFN f-chunk loop (num_fb=2) are all exercised ---
    out = jax.block_until_ready(
        transformer_encoder_layer(1, inputs, mask, p_f32, H,
                                  q_tile=8, kv_block=8, f_block=128))
    assert out.shape == (B, S, D)
    assert jnp.allclose(out, ref1, atol=2e-3, rtol=2e-3), "mismatch (f32, tiled path)"

    # --- iter != 0, f32, default (generation-aware) tiling ---
    out_d = jax.block_until_ready(transformer_encoder_layer(1, inputs, mask, p_f32, H))
    assert jnp.allclose(out_d, ref1, atol=2e-3, rtol=2e-3), "mismatch (f32, default path)"

    # --- iter == 0 branch (no pre-attention LayerNorm) ---
    out0 = jax.block_until_ready(
        transformer_encoder_layer(0, inputs, mask, p_f32, H,
                                  q_tile=8, kv_block=8, f_block=128))
    assert jnp.allclose(out0, ref0, atol=2e-3, rtol=2e-3), "mismatch (iter=0 branch)"

    # --- bf16 MXU operands (f32 accumulation): looser tolerance ---
    out_bf16 = jax.block_until_ready(
        transformer_encoder_layer(1, inputs, mask, p_bf16, H,
                                  q_tile=8, kv_block=8, f_block=128))
    assert jnp.allclose(out_bf16, ref1, atol=5e-2, rtol=5e-2), "mismatch (bf16 path)"

    print("KERNEL_OK")
</pallas_src>

<mosaic_0001>
module attributes {stable_mosaic.version = 11 : i64} {
  func.func @encoder_layer_kernel(%arg0: i32, %arg1: i32, %arg2: memref<1x8x32xf32, #tpu.memory_space<vmem>>, %arg3: memref<1x16x32xf32, #tpu.memory_space<vmem>>, %arg4: memref<1x2x1x8xf32, #tpu.memory_space<vmem>>, %arg5: memref<1x32xf32, #tpu.memory_space<vmem>>, %arg6: memref<1x32xf32, #tpu.memory_space<vmem>>, %arg7: memref<32x32xf32, #tpu.memory_space<vmem>>, %arg8: memref<1x32xf32, #tpu.memory_space<vmem>>, %arg9: memref<32x32xf32, #tpu.memory_space<vmem>>, %arg10: memref<1x32xf32, #tpu.memory_space<vmem>>, %arg11: memref<32x32xf32, #tpu.memory_space<vmem>>, %arg12: memref<1x32xf32, #tpu.memory_space<vmem>>, %arg13: memref<32x32xf32, #tpu.memory_space<vmem>>, %arg14: memref<1x32xf32, #tpu.memory_space<vmem>>, %arg15: memref<1x32xf32, #tpu.memory_space<vmem>>, %arg16: memref<1x32xf32, #tpu.memory_space<vmem>>, %arg17: memref<32x256xf32, #tpu.memory_space<vmem>>, %arg18: memref<1x256xf32, #tpu.memory_space<vmem>>, %arg19: memref<256x32xf32, #tpu.memory_space<vmem>>, %arg20: memref<1x32xf32, #tpu.memory_space<vmem>>, %arg21: memref<1x8x32xf32, #tpu.memory_space<vmem>>, %arg22: memref<2x8x32xf32, #tpu.memory_space<vmem>>, %arg23: memref<2x8x32xf32, #tpu.memory_space<vmem>>) attributes {dimension_semantics = [#tpu.dimension_semantics<parallel>, #tpu.dimension_semantics<arbitrary>], iteration_bounds = array<i64: 2, 2>, scalar_prefetch = 0 : i64, scratch_operands = 2 : i64, tpu.core_type = #tpu.core_type<tc>, window_params = [{transform_indices = @transform_0, window_bounds = array<i64: 1, 8, 32>}, {transform_indices = @transform_1, window_bounds = array<i64: 1, 16, 32>}, {pipeline_mode = #tpu.pipeline_mode<synchronous>, transform_indices = @transform_2, window_bounds = array<i64: 1, 2, 1, 8>}, {pipeline_mode = #tpu.pipeline_mode<synchronous>, transform_indices = @transform_3, window_bounds = array<i64: 1, 32>}, {pipeline_mode = #tpu.pipeline_mode<synchronous>, transform_indices = @transform_4, window_bounds = array<i64: 1, 32>}, {pipeline_mode = #tpu.pipeline_mode<synchronous>, transform_indices = @transform_5, window_bounds = array<i64: 32, 32>}, {pipeline_mode = #tpu.pipeline_mode<synchronous>, transform_indices = @transform_6, window_bounds = array<i64: 1, 32>}, {pipeline_mode = #tpu.pipeline_mode<synchronous>, transform_indices = @transform_7, window_bounds = array<i64: 32, 32>}, {pipeline_mode = #tpu.pipeline_mode<synchronous>, transform_indices = @transform_8, window_bounds = array<i64: 1, 32>}, {pipeline_mode = #tpu.pipeline_mode<synchronous>, transform_indices = @transform_9, window_bounds = array<i64: 32, 32>}, {pipeline_mode = #tpu.pipeline_mode<synchronous>, transform_indices = @transform_10, window_bounds = array<i64: 1, 32>}, {pipeline_mode = #tpu.pipeline_mode<synchronous>, transform_indices = @transform_11, window_bounds = array<i64: 32, 32>}, {pipeline_mode = #tpu.pipeline_mode<synchronous>, transform_indices = @transform_12, window_bounds = array<i64: 1, 32>}, {pipeline_mode = #tpu.pipeline_mode<synchronous>, transform_indices = @transform_13, window_bounds = array<i64: 1, 32>}, {pipeline_mode = #tpu.pipeline_mode<synchronous>, transform_indices = @transform_14, window_bounds = array<i64: 1, 32>}, {pipeline_mode = #tpu.pipeline_mode<synchronous>, transform_indices = @transform_15, window_bounds = array<i64: 32, 256>}, {pipeline_mode = #tpu.pipeline_mode<synchronous>, transform_indices = @transform_16, window_bounds = array<i64: 1, 256>}, {pipeline_mode = #tpu.pipeline_mode<synchronous>, transform_indices = @transform_17, window_bounds = array<i64: 256, 32>}, {pipeline_mode = #tpu.pipeline_mode<synchronous>, transform_indices = @transform_18, window_bounds = array<i64: 1, 32>}, {transform_indices = @transform_19, window_bounds = array<i64: 1, 8, 32>}]} {
    %c0_i32 = arith.constant 0 : i32
    %0 = arith.cmpi eq, %arg1, %c0_i32 : i32
    %1 = arith.extui %0 : i1 to i32
    %c0_i32_0 = arith.constant 0 : i32
    %2 = arith.cmpi ne, %1, %c0_i32_0 : i32
    scf.if %2 {
      %c0_64 = arith.constant 0 : index
      %c0_65 = arith.constant 0 : index
      %c0_66 = arith.constant 0 : index
      %125 = vector.load %arg3[%c0_64, %c0_65, %c0_66] : memref<1x16x32xf32, #tpu.memory_space<vmem>>, vector<1x16x32xf32>
      %126 = vector.shape_cast %125 : vector<1x16x32xf32> to vector<16x32xf32>
      %c0_67 = arith.constant 0 : index
      %c0_68 = arith.constant 0 : index
      %127 = vector.load %arg5[%c0_67, %c0_68] : memref<1x32xf32, #tpu.memory_space<vmem>>, vector<1x32xf32>
      %c0_69 = arith.constant 0 : index
      %c0_70 = arith.constant 0 : index
      %128 = vector.load %arg6[%c0_69, %c0_70] : memref<1x32xf32, #tpu.memory_space<vmem>>, vector<1x32xf32>
      %cst_71 = arith.constant dense<0.000000e+00> : vector<16xf32>
      %129 = vector.multi_reduction <add>, %126, %cst_71 [1] : vector<16x32xf32> to vector<16xf32>
      %130 = vector.shape_cast %129 : vector<16xf32> to vector<16x1xf32>
      %cst_72 = arith.constant 3.200000e+01 : f32
      %131 = vector.broadcast %cst_72 : f32 to vector<16x1xf32>
      %132 = arith.divf %130, %131 : vector<16x1xf32>
      %133 = vector.broadcast %132 : vector<16x1xf32> to vector<16x32xf32>
      %134 = arith.subf %126, %133 : vector<16x32xf32>
      %135 = arith.mulf %134, %134 : vector<16x32xf32>
      %cst_73 = arith.constant dense<0.000000e+00> : vector<16xf32>
      %136 = vector.multi_reduction <add>, %135, %cst_73 [1] : vector<16x32xf32> to vector<16xf32>
      %137 = vector.shape_cast %136 : vector<16xf32> to vector<16x1xf32>
      %cst_74 = arith.constant 3.200000e+01 : f32
      %138 = vector.broadcast %cst_74 : f32 to vector<16x1xf32>
      %139 = arith.divf %137, %138 : vector<16x1xf32>
      %140 = vector.broadcast %132 : vector<16x1xf32> to vector<16x32xf32>
      %141 = arith.subf %126, %140 : vector<16x32xf32>
      %cst_75 = arith.constant 9.99999997E-7 : f32
      %142 = vector.broadcast %cst_75 : f32 to vector<16x1xf32>
      %143 = arith.addf %139, %142 : vector<16x1xf32>
      %144 = math.rsqrt %143 : vector<16x1xf32>
      %145 = vector.broadcast %144 : vector<16x1xf32> to vector<16x32xf32>
      %146 = arith.mulf %141, %145 : vector<16x32xf32>
      %147 = vector.broadcast %127 : vector<1x32xf32> to vector<16x32xf32>
      %148 = arith.mulf %146, %147 : vector<16x32xf32>
      %149 = vector.broadcast %128 : vector<1x32xf32> to vector<16x32xf32>
      %150 = arith.addf %148, %149 : vector<16x32xf32>
      %c0_76 = arith.constant 0 : index
      %c0_77 = arith.constant 0 : index
      %151 = vector.load %arg9[%c0_76, %c0_77] : memref<32x32xf32, #tpu.memory_space<vmem>>, vector<32x32xf32>
      %cst_78 = arith.constant dense<0.000000e+00> : vector<16x32xf32>
      %152 = tpu.matmul %150, %151, %cst_78 {dimension_numbers = #tpu.dot_dimension_numbers<[1], [0], [0], [1], [0, 0, 1, 1], [], []>} : vector<16x32xf32>, vector<32x32xf32>, vector<16x32xf32> -> vector<16x32xf32>
      %c0_79 = arith.constant 0 : index
      %c0_80 = arith.constant 0 : index
      %153 = vector.load %arg10[%c0_79, %c0_80] : memref<1x32xf32, #tpu.memory_space<vmem>>, vector<1x32xf32>
      %154 = vector.broadcast %153 : vector<1x32xf32> to vector<16x32xf32>
      %155 = arith.addf %152, %154 : vector<16x32xf32>
      %c0_81 = arith.constant 0 : index
      %c0_82 = arith.constant 0 : index
      %156 = vector.load %arg11[%c0_81, %c0_82] : memref<32x32xf32, #tpu.memory_space<vmem>>, vector<32x32xf32>
      %cst_83 = arith.constant dense<0.000000e+00> : vector<16x32xf32>
      %157 = tpu.matmul %150, %156, %cst_83 {dimension_numbers = #tpu.dot_dimension_numbers<[1], [0], [0], [1], [0, 0, 1, 1], [], []>} : vector<16x32xf32>, vector<32x32xf32>, vector<16x32xf32> -> vector<16x32xf32>
      %c0_84 = arith.constant 0 : index
      %c0_85 = arith.constant 0 : index
      %158 = vector.load %arg12[%c0_84, %c0_85] : memref<1x32xf32, #tpu.memory_space<vmem>>, vector<1x32xf32>
      %159 = vector.broadcast %158 : vector<1x32xf32> to vector<16x32xf32>
      %160 = arith.addf %157, %159 : vector<16x32xf32>
      %161 = vector.shape_cast %155 : vector<16x32xf32> to vector<2x8x32xf32>
      %c0_86 = arith.constant 0 : index
      %c0_87 = arith.constant 0 : index
      %c0_88 = arith.constant 0 : index
      %162 = vector.load %arg22[%c0_86, %c0_87, %c0_88] : memref<2x8x32xf32, #tpu.memory_space<vmem>>, vector<2x8x32xf32>
      tpu.vector_store %arg22[%c0_86, %c0_87, %c0_88], %161 {strides = array<i32>} : memref<2x8x32xf32, #tpu.memory_space<vmem>>, vector<2x8x32xf32>,
      %163 = vector.shape_cast %160 : vector<16x32xf32> to vector<2x8x32xf32>
      %c0_89 = arith.constant 0 : index
      %c0_90 = arith.constant 0 : index
      %c0_91 = arith.constant 0 : index
      %164 = vector.load %arg23[%c0_89, %c0_90, %c0_91] : memref<2x8x32xf32, #tpu.memory_space<vmem>>, vector<2x8x32xf32>
      tpu.vector_store %arg23[%c0_89, %c0_90, %c0_91], %163 {strides = array<i32>} : memref<2x8x32xf32, #tpu.memory_space<vmem>>, vector<2x8x32xf32>,
    } else {
    }
    %c0 = arith.constant 0 : index
    %c0_1 = arith.constant 0 : index
    %c0_2 = arith.constant 0 : index
    %3 = vector.load %arg2[%c0, %c0_1, %c0_2] : memref<1x8x32xf32, #tpu.memory_space<vmem>>, vector<1x8x32xf32>
    %4 = vector.shape_cast %3 : vector<1x8x32xf32> to vector<8x32xf32>
    %c0_3 = arith.constant 0 : index
    %c0_4 = arith.constant 0 : index
    %5 = vector.load %arg5[%c0_3, %c0_4] : memref<1x32xf32, #tpu.memory_space<vmem>>, vector<1x32xf32>
    %c0_5 = arith.constant 0 : index
    %c0_6 = arith.constant 0 : index
    %6 = vector.load %arg6[%c0_5, %c0_6] : memref<1x32xf32, #tpu.memory_space<vmem>>, vector<1x32xf32>
    %cst = arith.constant dense<0.000000e+00> : vector<8xf32>
    %7 = vector.multi_reduction <add>, %4, %cst [1] : vector<8x32xf32> to vector<8xf32>
    %8 = vector.shape_cast %7 : vector<8xf32> to vector<8x1xf32>
    %cst_7 = arith.constant 3.200000e+01 : f32
    %9 = vector.broadcast %cst_7 : f32 to vector<8x1xf32>
    %10 = arith.divf %8, %9 : vector<8x1xf32>
    %11 = vector.broadcast %10 : vector<8x1xf32> to vector<8x32xf32>
    %12 = arith.subf %4, %11 : vector<8x32xf32>
    %13 = arith.mulf %12, %12 : vector<8x32xf32>
    %cst_8 = arith.constant dense<0.000000e+00> : vector<8xf32>
    %14 = vector.multi_reduction <add>, %13, %cst_8 [1] : vector<8x32xf32> to vector<8xf32>
    %15 = vector.shape_cast %14 : vector<8xf32> to vector<8x1xf32>
    %cst_9 = arith.constant 3.200000e+01 : f32
    %16 = vector.broadcast %cst_9 : f32 to vector<8x1xf32>
    %17 = arith.divf %15, %16 : vector<8x1xf32>
    %18 = vector.broadcast %10 : vector<8x1xf32> to vector<8x32xf32>
    %19 = arith.subf %4, %18 : vector<8x32xf32>
    %cst_10 = arith.constant 9.99999997E-7 : f32
    %20 = vector.broadcast %cst_10 : f32 to vector<8x1xf32>
    %21 = arith.addf %17, %20 : vector<8x1xf32>
    %22 = math.rsqrt %21 : vector<8x1xf32>
    %23 = vector.broadcast %22 : vector<8x1xf32> to vector<8x32xf32>
    %24 = arith.mulf %19, %23 : vector<8x32xf32>
    %25 = vector.broadcast %5 : vector<1x32xf32> to vector<8x32xf32>
    %26 = arith.mulf %24, %25 : vector<8x32xf32>
    %27 = vector.broadcast %6 : vector<1x32xf32> to vector<8x32xf32>
    %28 = arith.addf %26, %27 : vector<8x32xf32>
    %c0_11 = arith.constant 0 : index
    %c0_12 = arith.constant 0 : index
    %29 = vector.load %arg7[%c0_11, %c0_12] : memref<32x32xf32, #tpu.memory_space<vmem>>, vector<32x32xf32>
    %cst_13 = arith.constant dense<0.000000e+00> : vector<8x32xf32>
    %30 = tpu.matmul %28, %29, %cst_13 {dimension_numbers = #tpu.dot_dimension_numbers<[1], [0], [0], [1], [0, 0, 1, 1], [], []>} : vector<8x32xf32>, vector<32x32xf32>, vector<8x32xf32> -> vector<8x32xf32>
    %c0_14 = arith.constant 0 : index
    %c0_15 = arith.constant 0 : index
    %31 = vector.load %arg8[%c0_14, %c0_15] : memref<1x32xf32, #tpu.memory_space<vmem>>, vector<1x32xf32>
    %32 = vector.broadcast %31 : vector<1x32xf32> to vector<8x32xf32>
    %33 = arith.addf %30, %32 : vector<8x32xf32>
    %34 = vector.shape_cast %33 : vector<8x32xf32> to vector<8x4x8xf32>
    %cst_16 = arith.constant 0xFF800000 : f32
    %35 = vector.broadcast %cst_16 : f32 to vector<4x8x1xf32>
    %cst_17 = arith.constant 0.000000e+00 : f32
    %36 = vector.broadcast %cst_17 : f32 to vector<4x8x1xf32>
    %cst_18 = arith.constant 0.000000e+00 : f32
    %37 = vector.broadcast %cst_18 : f32 to vector<4x8x8xf32>
    %c0_i32_19 = arith.constant 0 : i32
    %c2_i32 = arith.constant 2 : i32
    %38 = arith.addi %c0_i32_19, %c2_i32 : i32
    %c1_i32 = arith.constant 1 : i32
    %39:3 = scf.for %arg24 = %c0_i32_19 to %38 step %c1_i32 iter_args(%arg25 = %35, %arg26 = %36, %arg27 = %37) -> (vector<4x8x1xf32>, vector<4x8x1xf32>, vector<4x8x8xf32>)  : i32 {
      %125 = arith.index_cast %arg24 : i32 to index
      %c0_64 = arith.constant 0 : index
      %c0_65 = arith.constant 0 : index
      %126 = vector.load %arg22[%125, %c0_64, %c0_65] : memref<2x8x32xf32, #tpu.memory_space<vmem>>, vector<1x8x32xf32>
      %127 = vector.shape_cast %126 : vector<1x8x32xf32> to vector<8x32xf32>
      %128 = vector.shape_cast %127 : vector<8x32xf32> to vector<8x4x8xf32>
      %129 = arith.index_cast %arg24 : i32 to index
      %c0_66 = arith.constant 0 : index
      %c0_67 = arith.constant 0 : index
      %130 = vector.load %arg23[%129, %c0_66, %c0_67] : memref<2x8x32xf32, #tpu.memory_space<vmem>>, vector<1x8x32xf32>
      %131 = vector.shape_cast %130 : vector<1x8x32xf32> to vector<8x32xf32>
      %132 = vector.shape_cast %131 : vector<8x32xf32> to vector<8x4x8xf32>
      "tpu.trace_start"() <{level = 10 : i32, message = "qhd,khd->hqk"}> : () -> ()
      %cst_68 = arith.constant dense<0.000000e+00> : vector<4x8x8xf32>
      %133 = tpu.matmul %34, %128, %cst_68 {dimension_numbers = #tpu.dot_dimension_numbers<[2], [2], [0], [0], [0, 1, 0, 0, 1, 0], [1], [1]>} : vector<8x4x8xf32>, vector<8x4x8xf32>, vector<4x8x8xf32> -> vector<4x8x8xf32>
      "tpu.trace_stop"() : () -> ()
      %c0_69 = arith.constant 0 : index
      %134 = arith.index_cast %arg24 : i32 to index
      %c0_70 = arith.constant 0 : index
      %c0_71 = arith.constant 0 : index
      %135 = vector.load %arg4[%c0_69, %134, %c0_70, %c0_71] : memref<1x2x1x8xf32, #tpu.memory_space<vmem>>, vector<1x1x1x8xf32>
      %136 = vector.shape_cast %135 : vector<1x1x1x8xf32> to vector<1x8xf32>
      %137 = vector.shape_cast %136 : vector<1x8xf32> to vector<1x1x8xf32>
      %138 = vector.broadcast %137 : vector<1x1x8xf32> to vector<4x8x8xf32>
      %139 = arith.addf %133, %138 : vector<4x8x8xf32>
      %cst_72 = arith.constant dense<0xFF800000> : vector<4x8xf32>
      %140 = vector.multi_reduction <maximumf>, %139, %cst_72 [2] : vector<4x8x8xf32> to vector<4x8xf32>
      %141 = vector.shape_cast %140 : vector<4x8xf32> to vector<4x8x1xf32>
      %142 = arith.maximumf %arg25, %141 : vector<4x8x1xf32>
      %143 = arith.subf %arg25, %142 : vector<4x8x1xf32>
      %144 = math.exp %143 : vector<4x8x1xf32>
      %145 = vector.broadcast %142 : vector<4x8x1xf32> to vector<4x8x8xf32>
      %146 = arith.subf %139, %145 : vector<4x8x8xf32>
      %147 = math.exp %146 : vector<4x8x8xf32>
      %148 = arith.mulf %144, %arg26 : vector<4x8x1xf32>
      %cst_73 = arith.constant dense<0.000000e+00> : vector<4x8xf32>
      %149 = vector.multi_reduction <add>, %147, %cst_73 [2] : vector<4x8x8xf32> to vector<4x8xf32>
      %150 = vector.shape_cast %149 : vector<4x8xf32> to vector<4x8x1xf32>
      %151 = arith.addf %148, %150 : vector<4x8x1xf32>
      %152 = vector.broadcast %144 : vector<4x8x1xf32> to vector<4x8x8xf32>
      %153 = arith.mulf %152, %arg27 : vector<4x8x8xf32>
      "tpu.trace_start"() <{level = 10 : i32, message = "hqk,khd->hqd"}> : () -> ()
      %cst_74 = arith.constant dense<0.000000e+00> : vector<4x8x8xf32>
      %154 = tpu.matmul %147, %132, %cst_74 {dimension_numbers = #tpu.dot_dimension_numbers<[2], [0], [1], [2], [0, 0, 0, 1, 1, 2], [0], [1]>} : vector<4x8x8xf32>, vector<8x4x8xf32>, vector<4x8x8xf32> -> vector<4x8x8xf32>
      "tpu.trace_stop"() : () -> ()
      %155 = arith.addf %153, %154 : vector<4x8x8xf32>
      scf.yield %142, %151, %155 : vector<4x8x1xf32>, vector<4x8x1xf32>, vector<4x8x8xf32>
    }
    %c2_i32_20 = arith.constant 2 : i32
    %40 = tpu.reciprocal %39#1 {approx = true} : vector<4x8x1xf32> -> vector<4x8x1xf32>
    %41 = vector.broadcast %40 : vector<4x8x1xf32> to vector<4x8x8xf32>
    %42 = arith.mulf %39#2, %41 : vector<4x8x8xf32>
    %43 = tpu.transpose %42, [1, 0, 2] : vector<4x8x8xf32> -> vector<8x4x8xf32>
    %44 = vector.shape_cast %43 : vector<8x4x8xf32> to vector<8x32xf32>
    %c0_21 = arith.constant 0 : index
    %c0_22 = arith.constant 0 : index
    %45 = vector.load %arg13[%c0_21, %c0_22] : memref<32x32xf32, #tpu.memory_space<vmem>>, vector<32x32xf32>
    %cst_23 = arith.constant dense<0.000000e+00> : vector<8x32xf32>
    %46 = tpu.matmul %44, %45, %cst_23 {dimension_numbers = #tpu.dot_dimension_numbers<[1], [0], [0], [1], [0, 0, 1, 1], [], []>} : vector<8x32xf32>, vector<32x32xf32>, vector<8x32xf32> -> vector<8x32xf32>
    %c0_24 = arith.constant 0 : index
    %c0_25 = arith.constant 0 : index
    %47 = vector.load %arg14[%c0_24, %c0_25] : memref<1x32xf32, #tpu.memory_space<vmem>>, vector<1x32xf32>
    %48 = vector.broadcast %47 : vector<1x32xf32> to vector<8x32xf32>
    %49 = arith.addf %46, %48 : vector<8x32xf32>
    %50 = arith.addf %49, %4 : vector<8x32xf32>
    %c0_26 = arith.constant 0 : index
    %c0_27 = arith.constant 0 : index
    %51 = vector.load %arg15[%c0_26, %c0_27] : memref<1x32xf32, #tpu.memory_space<vmem>>, vector<1x32xf32>
    %c0_28 = arith.constant 0 : index
    %c0_29 = arith.constant 0 : index
    %52 = vector.load %arg16[%c0_28, %c0_29] : memref<1x32xf32, #tpu.memory_space<vmem>>, vector<1x32xf32>
    %cst_30 = arith.constant dense<0.000000e+00> : vector<8xf32>
    %53 = vector.multi_reduction <add>, %50, %cst_30 [1] : vector<8x32xf32> to vector<8xf32>
    %54 = vector.shape_cast %53 : vector<8xf32> to vector<8x1xf32>
    %cst_31 = arith.constant 3.200000e+01 : f32
    %55 = vector.broadcast %cst_31 : f32 to vector<8x1xf32>
    %56 = arith.divf %54, %55 : vector<8x1xf32>
    %57 = vector.broadcast %56 : vector<8x1xf32> to vector<8x32xf32>
    %58 = arith.subf %50, %57 : vector<8x32xf32>
    %59 = arith.mulf %58, %58 : vector<8x32xf32>
    %cst_32 = arith.constant dense<0.000000e+00> : vector<8xf32>
    %60 = vector.multi_reduction <add>, %59, %cst_32 [1] : vector<8x32xf32> to vector<8xf32>
    %61 = vector.shape_cast %60 : vector<8xf32> to vector<8x1xf32>
    %cst_33 = arith.constant 3.200000e+01 : f32
    %62 = vector.broadcast %cst_33 : f32 to vector<8x1xf32>
    %63 = arith.divf %61, %62 : vector<8x1xf32>
    %64 = vector.broadcast %56 : vector<8x1xf32> to vector<8x32xf32>
    %65 = arith.subf %50, %64 : vector<8x32xf32>
    %cst_34 = arith.constant 9.99999997E-7 : f32
    %66 = vector.broadcast %cst_34 : f32 to vector<8x1xf32>
    %67 = arith.addf %63, %66 : vector<8x1xf32>
    %68 = math.rsqrt %67 : vector<8x1xf32>
    %69 = vector.broadcast %68 : vector<8x1xf32> to vector<8x32xf32>
    %70 = arith.mulf %65, %69 : vector<8x32xf32>
    %71 = vector.broadcast %51 : vector<1x32xf32> to vector<8x32xf32>
    %72 = arith.mulf %70, %71 : vector<8x32xf32>
    %73 = vector.broadcast %52 : vector<1x32xf32> to vector<8x32xf32>
    %74 = arith.addf %72, %73 : vector<8x32xf32>
    %cst_35 = arith.constant 0.000000e+00 : f32
    %75 = vector.broadcast %cst_35 : f32 to vector<8x32xf32>
    %c0_36 = arith.constant 0 : index
    %c0_37 = arith.constant 0 : index
    %76 = vector.load %arg17[%c0_36, %c0_37] : memref<32x256xf32, #tpu.memory_space<vmem>>, vector<32x128xf32>
    %cst_38 = arith.constant dense<0.000000e+00> : vector<8x128xf32>
    %77 = tpu.matmul %74, %76, %cst_38 {dimension_numbers = #tpu.dot_dimension_numbers<[1], [0], [0], [1], [0, 0, 1, 1], [], []>} : vector<8x32xf32>, vector<32x128xf32>, vector<8x128xf32> -> vector<8x128xf32>
    %c0_39 = arith.constant 0 : index
    %c0_40 = arith.constant 0 : index
    %78 = vector.load %arg18[%c0_39, %c0_40] : memref<1x256xf32, #tpu.memory_space<vmem>>, vector<1x128xf32>
    %79 = vector.broadcast %78 : vector<1x128xf32> to vector<8x128xf32>
    %80 = arith.addf %77, %79 : vector<8x128xf32>
    %cst_41 = arith.constant 5.000000e-01 : f32
    %81 = vector.broadcast %cst_41 : f32 to vector<8x128xf32>
    %82 = arith.mulf %81, %80 : vector<8x128xf32>
    %83 = arith.mulf %80, %80 : vector<8x128xf32>
    %84 = arith.mulf %80, %83 : vector<8x128xf32>
    %cst_42 = arith.constant 4.471500e-02 : f32
    %85 = vector.broadcast %cst_42 : f32 to vector<8x128xf32>
    %86 = arith.mulf %85, %84 : vector<8x128xf32>
    %87 = arith.addf %80, %86 : vector<8x128xf32>
    %cst_43 = arith.constant 0.797884583 : f32
    %88 = vector.broadcast %cst_43 : f32 to vector<8x128xf32>
    %89 = arith.mulf %88, %87 : vector<8x128xf32>
    %90 = math.tanh %89 : vector<8x128xf32>
    %cst_44 = arith.constant 1.000000e+00 : f32
    %91 = vector.broadcast %cst_44 : f32 to vector<8x128xf32>
    %92 = arith.addf %91, %90 : vector<8x128xf32>
    %93 = arith.mulf %82, %92 : vector<8x128xf32>
    %c0_45 = arith.constant 0 : index
    %c0_46 = arith.constant 0 : index
    %94 = vector.load %arg19[%c0_45, %c0_46] : memref<256x32xf32, #tpu.memory_space<vmem>>, vector<128x32xf32>
    %cst_47 = arith.constant dense<0.000000e+00> : vector<8x32xf32>
    %95 = tpu.matmul %93, %94, %cst_47 {dimension_numbers = #tpu.dot_dimension_numbers<[1], [0], [0], [1], [0, 0, 1, 1], [], []>} : vector<8x128xf32>, vector<128x32xf32>, vector<8x32xf32> -> vector<8x32xf32>
    %96 = arith.addf %75, %95 : vector<8x32xf32>
    %c0_48 = arith.constant 0 : index
    %c128 = arith.constant 128 : index
    %97 = vector.load %arg17[%c0_48, %c128] : memref<32x256xf32, #tpu.memory_space<vmem>>, vector<32x128xf32>
    %cst_49 = arith.constant dense<0.000000e+00> : vector<8x128xf32>
    %98 = tpu.matmul %74, %97, %cst_49 {dimension_numbers = #tpu.dot_dimension_numbers<[1], [0], [0], [1], [0, 0, 1, 1], [], []>} : vector<8x32xf32>, vector<32x128xf32>, vector<8x128xf32> -> vector<8x128xf32>
    %c0_50 = arith.constant 0 : index
    %c128_51 = arith.constant 128 : index
    %99 = vector.load %arg18[%c0_50, %c128_51] : memref<1x256xf32, #tpu.memory_space<vmem>>, vector<1x128xf32>
    %100 = vector.broadcast %99 : vector<1x128xf32> to vector<8x128xf32>
    %101 = arith.addf %98, %100 : vector<8x128xf32>
    %cst_52 = arith.constant 5.000000e-01 : f32
    %102 = vector.broadcast %cst_52 : f32 to vector<8x128xf32>
    %103 = arith.mulf %102, %101 : vector<8x128xf32>
    %104 = arith.mulf %101, %101 : vector<8x128xf32>
    %105 = arith.mulf %101, %104 : vector<8x128xf32>
    %cst_53 = arith.constant 4.471500e-02 : f32
    %106 = vector.broadcast %cst_53 : f32 to vector<8x128xf32>
    %107 = arith.mulf %106, %105 : vector<8x128xf32>
    %108 = arith.addf %101, %107 : vector<8x128xf32>
    %cst_54 = arith.constant 0.797884583 : f32
    %109 = vector.broadcast %cst_54 : f32 to vector<8x128xf32>
    %110 = arith.mulf %109, %108 : vector<8x128xf32>
    %111 = math.tanh %110 : vector<8x128xf32>
    %cst_55 = arith.constant 1.000000e+00 : f32
    %112 = vector.broadcast %cst_55 : f32 to vector<8x128xf32>
    %113 = arith.addf %112, %111 : vector<8x128xf32>
    %114 = arith.mulf %103, %113 : vector<8x128xf32>
    %c128_56 = arith.constant 128 : index
    %c0_57 = arith.constant 0 : index
    %115 = vector.load %arg19[%c128_56, %c0_57] : memref<256x32xf32, #tpu.memory_space<vmem>>, vector<128x32xf32>
    %cst_58 = arith.constant dense<0.000000e+00> : vector<8x32xf32>
    %116 = tpu.matmul %114, %115, %cst_58 {dimension_numbers = #tpu.dot_dimension_numbers<[1], [0], [0], [1], [0, 0, 1, 1], [], []>} : vector<8x128xf32>, vector<128x32xf32>, vector<8x32xf32> -> vector<8x32xf32>
    %117 = arith.addf %96, %116 : vector<8x32xf32>
    %c0_59 = arith.constant 0 : index
    %c0_60 = arith.constant 0 : index
    %118 = vector.load %arg20[%c0_59, %c0_60] : memref<1x32xf32, #tpu.memory_space<vmem>>, vector<1x32xf32>
    %119 = vector.broadcast %118 : vector<1x32xf32> to vector<8x32xf32>
    %120 = arith.addf %117, %119 : vector<8x32xf32>
    %121 = arith.addf %120, %50 : vector<8x32xf32>
    %c0_61 = arith.constant 0 : index
    %c0_62 = arith.constant 0 : index
    %c0_63 = arith.constant 0 : index
    %122 = vector.load %arg21[%c0_61, %c0_62, %c0_63] : memref<1x8x32xf32, #tpu.memory_space<vmem>>, vector<1x8x32xf32>
    %123 = vector.shape_cast %122 : vector<1x8x32xf32> to vector<8x32xf32>
    %124 = vector.shape_cast %121 : vector<8x32xf32> to vector<1x8x32xf32>
    tpu.vector_store %arg21[%c0_61, %c0_62, %c0_63], %124 {strides = array<i32>} : memref<1x8x32xf32, #tpu.memory_space<vmem>>, vector<1x8x32xf32>,
    return
  }
  func.func @transform_0(%arg0: i32, %arg1: i32) -> (i32, i32, i32) {
    %c0_i32 = arith.constant 0 : i32
    %c0_i32_0 = arith.constant 0 : i32
    return %arg0, %arg1, %c0_i32 : i32, i32, i32
  }
  func.func @transform_1(%arg0: i32, %arg1: i32) -> (i32, i32, i32) {
    %c0_i32 = arith.constant 0 : i32
    %c0_i32_0 = arith.constant 0 : i32
    %c0_i32_1 = arith.constant 0 : i32
    return %arg0, %c0_i32, %c0_i32_0 : i32, i32, i32
  }
  func.func @transform_2(%arg0: i32, %arg1: i32) -> (i32, i32, i32, i32) {
    %c0_i32 = arith.constant 0 : i32
    %c0_i32_0 = arith.constant 0 : i32
    %c0_i32_1 = arith.constant 0 : i32
    %c0_i32_2 = arith.constant 0 : i32
    return %arg0, %c0_i32, %c0_i32_0, %c0_i32_1 : i32, i32, i32, i32
  }
  func.func @transform_3(%arg0: i32, %arg1: i32) -> (i32, i32) {
    %c0_i32 = arith.constant 0 : i32
    %c0_i32_0 = arith.constant 0 : i32
    %c0_i32_1 = arith.constant 0 : i32
    return %c0_i32, %c0_i32_0 : i32, i32
  }
  func.func @transform_4(%arg0: i32, %arg1: i32) -> (i32, i32) {
    %c0_i32 = arith.constant 0 : i32
    %c0_i32_0 = arith.constant 0 : i32
    %c0_i32_1 = arith.constant 0 : i32
    return %c0_i32, %c0_i32_0 : i32, i32
  }
  func.func @transform_5(%arg0: i32, %arg1: i32) -> (i32, i32) {
    %c0_i32 = arith.constant 0 : i32
    %c0_i32_0 = arith.constant 0 : i32
    %c0_i32_1 = arith.constant 0 : i32
    return %c0_i32, %c0_i32_0 : i32, i32
  }
  func.func @transform_6(%arg0: i32, %arg1: i32) -> (i32, i32) {
    %c0_i32 = arith.constant 0 : i32
    %c0_i32_0 = arith.constant 0 : i32
    %c0_i32_1 = arith.constant 0 : i32
    return %c0_i32, %c0_i32_0 : i32, i32
  }
  func.func @transform_7(%arg0: i32, %arg1: i32) -> (i32, i32) {
    %c0_i32 = arith.constant 0 : i32
    %c0_i32_0 = arith.constant 0 : i32
    %c0_i32_1 = arith.constant 0 : i32
    return %c0_i32, %c0_i32_0 : i32, i32
  }
  func.func @transform_8(%arg0: i32, %arg1: i32) -> (i32, i32) {
    %c0_i32 = arith.constant 0 : i32
    %c0_i32_0 = arith.constant 0 : i32
    %c0_i32_1 = arith.constant 0 : i32
    return %c0_i32, %c0_i32_0 : i32, i32
  }
  func.func @transform_9(%arg0: i32, %arg1: i32) -> (i32, i32) {
    %c0_i32 = arith.constant 0 : i32
    %c0_i32_0 = arith.constant 0 : i32
    %c0_i32_1 = arith.constant 0 : i32
    return %c0_i32, %c0_i32_0 : i32, i32
  }
  func.func @transform_10(%arg0: i32, %arg1: i32) -> (i32, i32) {
    %c0_i32 = arith.constant 0 : i32
    %c0_i32_0 = arith.constant 0 : i32
    %c0_i32_1 = arith.constant 0 : i32
    return %c0_i32, %c0_i32_0 : i32, i32
  }
  func.func @transform_11(%arg0: i32, %arg1: i32) -> (i32, i32) {
    %c0_i32 = arith.constant 0 : i32
    %c0_i32_0 = arith.constant 0 : i32
    %c0_i32_1 = arith.constant 0 : i32
    return %c0_i32, %c0_i32_0 : i32, i32
  }
  func.func @transform_12(%arg0: i32, %arg1: i32) -> (i32, i32) {
    %c0_i32 = arith.constant 0 : i32
    %c0_i32_0 = arith.constant 0 : i32
    %c0_i32_1 = arith.constant 0 : i32
    return %c0_i32, %c0_i32_0 : i32, i32
  }
  func.func @transform_13(%arg0: i32, %arg1: i32) -> (i32, i32) {
    %c0_i32 = arith.constant 0 : i32
    %c0_i32_0 = arith.constant 0 : i32
    %c0_i32_1 = arith.constant 0 : i32
    return %c0_i32, %c0_i32_0 : i32, i32
  }
  func.func @transform_14(%arg0: i32, %arg1: i32) -> (i32, i32) {
    %c0_i32 = arith.constant 0 : i32
    %c0_i32_0 = arith.constant 0 : i32
    %c0_i32_1 = arith.constant 0 : i32
    return %c0_i32, %c0_i32_0 : i32, i32
  }
  func.func @transform_15(%arg0: i32, %arg1: i32) -> (i32, i32) {
    %c0_i32 = arith.constant 0 : i32
    %c0_i32_0 = arith.constant 0 : i32
    %c0_i32_1 = arith.constant 0 : i32
    return %c0_i32, %c0_i32_0 : i32, i32
  }
  func.func @transform_16(%arg0: i32, %arg1: i32) -> (i32, i32) {
    %c0_i32 = arith.constant 0 : i32
    %c0_i32_0 = arith.constant 0 : i32
    %c0_i32_1 = arith.constant 0 : i32
    return %c0_i32, %c0_i32_0 : i32, i32
  }
  func.func @transform_17(%arg0: i32, %arg1: i32) -> (i32, i32) {
    %c0_i32 = arith.constant 0 : i32
    %c0_i32_0 = arith.constant 0 : i32
    %c0_i32_1 = arith.constant 0 : i32
    return %c0_i32, %c0_i32_0 : i32, i32
  }
  func.func @transform_18(%arg0: i32, %arg1: i32) -> (i32, i32) {
    %c0_i32 = arith.constant 0 : i32
    %c0_i32_0 = arith.constant 0 : i32
    %c0_i32_1 = arith.constant 0 : i32
    return %c0_i32, %c0_i32_0 : i32, i32
  }
  func.func @transform_19(%arg0: i32, %arg1: i32) -> (i32, i32, i32) {
    %c0_i32 = arith.constant 0 : i32
    %c0_i32_0 = arith.constant 0 : i32
    return %arg0, %arg1, %c0_i32 : i32, i32, i32
  }
}

</mosaic_0001>

<bundles_post_ra>
// kernel: tpu_custom_call.1
= control target key start
LH: loop header
LB: loop body
LE: loop exit
PB: predicated region body
PF: predicated region fallthrough
CT: control target
= control target key end

     0   :  { %s6755_s0 = inlined_call_operand.hbm [shape: f32[2,16,32], index: 0, kind: input, shape index: {}]   ;;  %s6756_s1 = inlined_call_operand.hbm [shape: f32[2,16,32], index: 1, kind: input, shape index: {}]   ;;  %s6757_s2 = inlined_call_operand.hbm [shape: f32[2,2,1,8], index: 2, kind: input, shape index: {}]   ;;  %s6758_s3 = inlined_call_operand.hbm [shape: f32[1,32], index: 3, kind: input, shape index: {}]   ;;  %s6759_s4 = inlined_call_operand.hbm [shape: f32[1,32], index: 4, kind: input, shape index: {}]   ;;  %s6760_s5 = inlined_call_operand.hbm [shape: f32[32,32], index: 5, kind: input, shape index: {}]   ;;  %s6761_s6 = inlined_call_operand.hbm [shape: f32[1,32], index: 6, kind: input, shape index: {}]   ;;  %s6762_s7 = inlined_call_operand.hbm [shape: f32[32,32], index: 7, kind: input, shape index: {}]   ;;  %s6763_s8 = inlined_call_operand.hbm [shape: f32[1,32], index: 8, kind: input, shape index: {}]   ;;  %s6764_s9 = inlined_call_operand.hbm [shape: f32[32,32], index: 9, kind: input, shape index: {}]   ;;  %s6765_s10 = inlined_call_operand.hbm [shape: f32[1,32], index: 10, kind: input, shape index: {}]   ;;  %s6766_s11 = inlined_call_operand.hbm [shape: f32[32,32], index: 11, kind: input, shape index: {}]   ;;  %s6767_s12 = inlined_call_operand.hbm [shape: f32[1,32], index: 12, kind: input, shape index: {}]   ;;  %s6768_s13 = inlined_call_operand.hbm [shape: f32[1,32], index: 13, kind: input, shape index: {}]   ;;  %s6769_s14 = inlined_call_operand.hbm [shape: f32[1,32], index: 14, kind: input, shape index: {}]   ;;  %s6770_s15 = inlined_call_operand.hbm [shape: f32[32,256], index: 15, kind: input, shape index: {}]   ;;  %s6771_s16 = inlined_call_operand.hbm [shape: f32[1,256], index: 16, kind: input, shape index: {}]   ;;  %s6772_s17 = inlined_call_operand.hbm [shape: f32[256,32], index: 17, kind: input, shape index: {}]   ;;  %s6773_s18 = inlined_call_operand.hbm [shape: f32[1,32], index: 18, kind: input, shape index: {}]   ;;  %s6774_s19 = inlined_call_operand.hbm [shape: f32[2,16,32], index: 19, kind: output, shape index: {}]  }
   0x1   :  { %6813 = sst [smem:[#allocation60_spill]] %s6755_s0 }
   0x2   :  { %6814 = sst [smem:[#allocation61_spill]] %s6756_s1 }
   0x3   :  { %6815 = sst [smem:[#allocation62_spill]] %s6757_s2 }
   0x4   :  { %6816 = sst [smem:[#allocation63_spill]] %s6758_s3 }
   0x5   :  { %6817 = sst [smem:[#allocation64_spill]] %s6759_s4 }
   0x6   :  { %6818 = sst [smem:[#allocation65_spill]] %s6760_s5 }
   0x7   :  { %6819 = sst [smem:[#allocation66_spill]] %s6761_s6 }
   0x8   :  { %6820 = sst [smem:[#allocation67_spill]] %s6762_s7 }
   0x9   :  { %6821 = sst [smem:[#allocation68_spill]] %s6763_s8 }
   0xa   :  { %6822 = sst [smem:[#allocation69_spill]] %s6764_s9 }
   0xb   :  { %6823 = sst [smem:[#allocation70_spill]] %s6765_s10 }
   0xc   :  { %6824 = sst [smem:[#allocation71_spill]] %s6766_s11 }
   0xd   :  { %6825 = sst [smem:[#allocation72_spill]] %s6767_s12 }
   0xe   :  { %6826 = sst [smem:[#allocation73_spill]] %s6768_s13 }
   0xf   :  { %6827 = sst [smem:[#allocation74_spill]] %s6769_s14 }
  0x10   :  { %6828 = sst [smem:[#allocation75_spill]] %s6770_s15 }
  0x11   :  { %6829 = sst [smem:[#allocation76_spill]] %s6771_s16 }
  0x12   :  { %6830 = sst [smem:[#allocation77_spill]] %s6773_s18 }
  0x13   :  { %6831 = sst [smem:[#allocation78_spill]] %s6774_s19 }
  0x14   :  { %24 = vsyncpa [#allocation5], 0 }
  0x15   :  { %26 = vsyncpa [#allocation5 + $0x1], 0 }
  0x16   :  { %27 = vsyncpa [#allocation8], 0 }
  0x17   :  { %29 = vsyncpa [#allocation8 + $0x1], 0 }
  0x18   :  { %30 = vsyncpa [#allocation11], 0 }
  0x19   :  { %31 = vsyncpa [#allocation14], 0 }
  0x1a   :  { %32 = vsyncpa [#allocation17], 0 }
  0x1b   :  { %33 = vsyncpa [#allocation20], 0 }
  0x1c   :  { %34 = vsyncpa [#allocation23], 0 }
  0x1d   :  { %35 = vsyncpa [#allocation26], 0 }
  0x1e   :  { %36 = vsyncpa [#allocation29], 0 }
  0x1f   :  { %37 = vsyncpa [#allocation32], 0 }
  0x20   :  { %38 = vsyncpa [#allocation6], 0 }
  0x21   :  { %40 = vsyncpa [#allocation6 + $0x1], 0  ;;  %s5680_s0 = smov 0   ;;  %s5682_s30 = smov 0  }
  0x22   :  { %s5684_s20 = smov 0   ;;  %s5686_s21 = smov 0  }
  0x23   :  { %s5688_s1 = smov 0   ;;  %s5690_s22 = smov 0  }
  0x24   :  { %s5692_s2 = smov 0   ;;  %s5694_s23 = smov 0  }
  0x25   :  { %s5696_s24 = smov 0   ;;  %s5698_s25 = smov 0  }
  0x26   :  { %s5700_s3 = smov 0  }
  0x27 LB: > { %6832 = sst [smem:[#allocation47_spill]] %s5449_s30  ;;  %s5734_s26 = sadd.s32 4294967295, %s5485_s3   ;;  %s5485_s3 = sphi %s5700_s3, %s46_s3   ;;  %s5481_s25 = sphi %s5698_s25, %s6950_s25   ;;  %s5477_s24 = sphi %s5696_s24, %s6949_s24   ;;  %s5473_s23 = sphi %s5694_s23, %s6945_s23   ;;  %s5469_s2 = sphi %s5692_s2, %s6944_s2   ;;  %s5465_s22 = sphi %s5690_s22, %s6948_s22   ;;  %s5461_s1 = sphi %s5688_s1, %s6943_s1   ;;  %s5457_s21 = sphi %s5686_s21, %s6942_s21   ;;  %s5453_s20 = sphi %s5684_s20, %s6947_s20   ;;  %s5449_s30 = sphi %s5682_s30, %s6941_s30   ;;  %s5445_s0 = sphi %s5680_s0, %s6940_s0  }
  0x28   : > { %6833 = sst [smem:[#allocation48_spill]] %s5453_s20  ;;  %p106_p0 = scmp.ne.s32.totalorder %s5449_s30, %s5445_s0 }
  0x29   : > { %6834 = sst [smem:[#allocation49_spill]] %s5457_s21  ;;  %p6790_p1 = scmp.eq.s32.totalorder %s5734_s26, 0 }
  0x2a   : > { %6835 = sst [smem:[#allocation50_spill]] %s5461_s1  ;;  %p3863_p2 = scmp.ge.s32.totalorder %s5485_s3, 1 }
  0x2b   : > { %6836 = sst [smem:[#allocation51_spill]] %s5465_s22  ;;  %p507_p3 = scmp.lt.s32.totalorder %s5485_s3, 5 }
  0x2c   : > { %6837 = sst [smem:[#allocation52_spill]] %s5469_s2  ;;  %s3950_s27 = sshll.u32 %s5473_s23, 5 }
  0x2d   : > { %6838 = sst [smem:[#allocation53_spill]] %s5473_s23  ;;  %p5743_p4 = por %p106_p0, %p6790_p1 }
  0x2e   : > { %6839 = sst [smem:[#allocation54_spill]] %s5477_s24  ;;  %s6845_s2 = sld [smem:[#allocation62_spill]] }
  0x2f   : > { %6840 = sst [smem:[#allocation55_spill]] %s5481_s25  ;;  %p5752_p5 = pnand %p3863_p2, %p507_p3 }
  0x30   : > { %6841 = sst [smem:[#allocation56_spill]] %s5485_s3  ;;  %s5539_s23 = smov [#allocation9]  }
  0x31   : > { %6842 = sst [smem:[#allocation57_spill]] %s5734_s26  ;;  %s522_s30 = sshll.u32 %s5539_s23, 4  ;;  %s5758_s30 = int_to_ptr.vmem [resolvable:$true] %s522_s30 }
  0x32   : > { %s6843_s28 = scalar_select %p5743_p4, 1, 0 }
  0x33   : > { %s6847_s0 = scalar_select %p5752_p5, 1, 0 }
  0x34   : > { %6844 = sst [smem:[#allocation58_spill]] %s6843_s28  ;;  %s6846_s18 = smov %s6845_s2 }
  0x35   : > { %s5750_s20 = scalar_lea.hbm %s6845_s2, %s3950_s27  ;;  %6848 = sst [smem:[#allocation59_spill]] %s6847_s0 }
  0x36   : > { %p4370_p6 = pneg %p5752_p5  ;;  %s4733_s27 = scalar_lea.hbm %s5750_s20, 32 }
  0x37   : > { %p4734_p9 = scmp.ne.s32.totalorder %s5750_s20, %s4733_s27  ;;  %s4738_s28 = scalar_lea.hbm %s6846_s18, 64 }
  0x38   : > { %p5762_p7 = pnand %p4370_p6, %p5743_p4  ;;  %p5768_p8 = pnand %p4370_p6, %p6790_p1 }
  0x39   : > { %p4739_p13 = scmp.lt.u32.totalorder %s5750_s20, %s6846_s18  ;;  %p4740_p0 = scmp.lt.u32.totalorder %s4738_s28, %s4733_s27 }
  0x3a   : > { %s6850_s2 = scalar_select %p5768_p8, 1, 0 }
  0x3b   : > { %p4735_p10 = pneg %p5762_p7  ;;  %p4741_p2 = por %p4740_p0, %p4739_p13 }
  0x3c   : > { %p4742_p3 = scmp.lt.u32.totalorder %s4733_s27, %s5750_s20 }
  0x3d   : > { %p4736_p11 = pnand %p4735_p10, %p4734_p9 }
  0x3e   : > { %p4743_p6 = por %p4742_p3, %p4741_p2 }
  0x3f   : > { %p4737_p12 = pneg %p4736_p11 }
  0x41   : > { %p4744_p1 = pnand %p4743_p6, %p4737_p12 }
  0x43   : > { %4747 = shalt.err (!%p4744_p1)
}
  0x44   : > { %s4748_s21 = scalar_lea.vmem %s5758_s30, 32  ;;  %p4756_p5 = scmp.lt.s32.totalorder %s5758_s30, %s5758_s30 }
  0x45   : > { %p4749_p9 = scmp.ne.s32.totalorder %s5758_s30, %s4748_s21  ;;  %p4757_p8 = scmp.lt.s32.totalorder %s4748_s21, %s4748_s21 }
  0x47   : > { %p4751_p11 = pnand %p4749_p9, %p4735_p10  ;;  %p4758_p0 = por %p4757_p8, %p4756_p5 }
  0x49   : > { %p4752_p4 = pneg %p4751_p11 }
  0x4b   : > { %p4759_p13 = pnand %p4758_p0, %p4752_p4 }
  0x4d   : > { %4762 = shalt.err (!%p4759_p13)
}
  0x4e   : > { %s6805_s26 = smov 16   ;;  %s5541_s28 = smov 1  }
  0x4f   : > { %4373 = dma.hbm_to_vmem [thread:$0]  (!%p5762_p7), %s5750_s20, 32, %s5758_s30, [#allocation8], %s6805_s26, %s6805_s26, %s5541_s28  }
  0x50   : > { %s5542_s0 = smov [#allocation10]   ;;  %s5543_s23 = smov [#allocation13]  }
  0x51   : > { %s536_s27 = sshll.u32 %s5542_s0, 4  ;;  %s557_s29 = sshll.u32 %s5543_s23, 4  ;;  %s537_s27 = int_to_ptr.vmem [resolvable:$true] %s536_s27  ;;  %s558_s29 = int_to_ptr.vmem [resolvable:$true] %s557_s29 }
  0x52   : > { %s6851_s1 = sld [smem:[#allocation63_spill]]  ;;  %p6853_p4 = scmp.ne.s32.totalorder %s6850_s2, 0 }
  0x54   : > { %p5808_p5 = pneg %p6853_p4 }
  0x58   : > { %s6852_s16 = smov %s6851_s1  ;;  %s4763_s22 = scalar_lea.hbm %s6851_s1, 16 }
  0x59   : > { %p4764_p1 = scmp.ne.s32.totalorder %s6852_s16, %s4763_s22  ;;  %p4770_p10 = scmp.lt.u32.totalorder %s4763_s22, %s6852_s16 }
  0x5b   : > { %p4766_p7 = pnand %p5808_p5, %p4764_p1 }
  0x5d   : > { %p4767_p8 = pneg %p4766_p7 }
  0x5f   : > { %p4772_p12 = pnand %p4770_p10, %p4767_p8 }
  0x61   : > { %4775 = shalt.err (!%p4772_p12)
}
  0x62   : > { %s4776_s18 = scalar_lea.vmem %s537_s27, 16  ;;  %s4783_s1 = scalar_lea.vmem %s537_s27, 32 }
  0x63   : > { %p4777_p2 = scmp.ne.s32.totalorder %s537_s27, %s4776_s18  ;;  %p4784_p9 = scmp.lt.s32.totalorder %s537_s27, %s537_s27 }
  0x64   : > { %p4785_p11 = scmp.lt.s32.totalorder %s4783_s1, %s4776_s18 }
  0x65   : > { %p4779_p3 = pnand %p4777_p2, %p5808_p5 }
  0x66   : > { %p4786_p0 = por %p4785_p11, %p4784_p9 }
  0x67   : > { %p4780_p6 = pneg %p4779_p3 }
  0x69   : > { %p4787_p13 = pnand %p4786_p0, %p4780_p6 }
  0x6b   : > { %4790 = shalt.err (!%p4787_p13)
}
  0x6c   : > { %4376 = dma.hbm_to_vmem [thread:$0]  (!%p6853_p4), %s6852_s16, 16, %s537_s27, [#allocation11]  }
  0x6d   : > { %s6855_s5 = sld [smem:[#allocation65_spill]] }
  0x73   : > { %s4791_s28 = scalar_lea.hbm %s6855_s5, 512 }
  0x74   : > { %p4792_p1 = scmp.ne.s32.totalorder %s6855_s5, %s4791_s28  ;;  %p4798_p10 = scmp.lt.u32.totalorder %s4791_s28, %s6855_s5 }
  0x76   : > { %p4794_p7 = pnand %p4792_p1, %p5808_p5 }
  0x78   : > { %p4795_p8 = pneg %p4794_p7 }
  0x7a   : > { %p4800_p12 = pnand %p4798_p10, %p4795_p8 }
  0x7c   : > { %4803 = shalt.err (!%p4800_p12)
}
  0x7d   : > { %s4804_s20 = scalar_lea.vmem %s558_s29, 512  ;;  %p4812_p9 = scmp.lt.s32.totalorder %s558_s29, %s558_s29 }
  0x7e   : > { %p4805_p2 = scmp.ne.s32.totalorder %s558_s29, %s4804_s20  ;;  %p4813_p11 = scmp.lt.s32.totalorder %s4804_s20, %s4804_s20 }
  0x80   : > { %p4807_p3 = pnand %p4805_p2, %p5808_p5  ;;  %p4814_p0 = por %p4813_p11, %p4812_p9 }
  0x82   : > { %p4808_p6 = pneg %p4807_p3 }
  0x84   : > { %p4815_p13 = pnand %p4814_p0, %p4808_p6 }
  0x86   : > { %4818 = shalt.err (!%p4815_p13)
}
  0x87   : > { %s6807_s27 = smov 128   ;;  %s6809_s18 = smov 8  }
  0x88   : > { %4382 = dma.hbm_to_vmem [thread:$0]  (!%p6853_p4), %s6855_s5, 512, %s558_s29, [#allocation14], %s6807_s27, %s6807_s27, %s6809_s18  }
  0x89   : > { %s5546_s25 = smov [#allocation16]   ;;  %s5547_s19 = smov [#allocation19]  }
  0x8a   : > { %s581_s22 = sshll.u32 %s5546_s25, 4  ;;  %s605_s28 = sshll.u32 %s5547_s19, 4  ;;  %s582_s22 = int_to_ptr.vmem [resolvable:$true] %s581_s22  ;;  %s606_s28 = int_to_ptr.vmem [resolvable:$true] %s605_s28 }
  0x8b   : > { %s6856_s7 = sld [smem:[#allocation67_spill]] }
  0x91   : > { %s4819_s21 = scalar_lea.hbm %s6856_s7, 512 }
  0x92   : > { %p4820_p1 = scmp.ne.s32.totalorder %s6856_s7, %s4819_s21  ;;  %p4826_p10 = scmp.lt.u32.totalorder %s4819_s21, %s6856_s7 }
  0x94   : > { %p4822_p7 = pnand %p4820_p1, %p5808_p5 }
  0x96   : > { %p4823_p8 = pneg %p4822_p7 }
  0x98   : > { %p4828_p12 = pnand %p4826_p10, %p4823_p8 }
  0x9a   : > { %4831 = shalt.err (!%p4828_p12)
}
  0x9b   : > { %s4832_s29 = scalar_lea.vmem %s582_s22, 512  ;;  %p4840_p9 = scmp.lt.s32.totalorder %s582_s22, %s582_s22 }
  0x9c   : > { %p4833_p2 = scmp.ne.s32.totalorder %s582_s22, %s4832_s29  ;;  %p4841_p11 = scmp.lt.s32.totalorder %s4832_s29, %s4832_s29 }
  0x9e   : > { %p4835_p3 = pnand %p4833_p2, %p5808_p5  ;;  %p4842_p0 = por %p4841_p11, %p4840_p9 }
  0xa0   : > { %p4836_p6 = pneg %p4835_p3 }
  0xa2   : > { %p4843_p13 = pnand %p4842_p0, %p4836_p6 }
  0xa4   : > { %4846 = shalt.err (!%p4843_p13)
}
  0xa5   : > { %4388 = dma.hbm_to_vmem [thread:$0]  (!%p6853_p4), %s6856_s7, 512, %s582_s22, [#allocation17], %s6807_s27, %s6807_s27, %s6809_s18  }
  0xa6   : > { %s6857_s9 = sld [smem:[#allocation69_spill]] }
  0xac   : > { %s4847_s25 = scalar_lea.hbm %s6857_s9, 512 }
  0xad   : > { %p4848_p1 = scmp.ne.s32.totalorder %s6857_s9, %s4847_s25  ;;  %p4854_p10 = scmp.lt.u32.totalorder %s4847_s25, %s6857_s9 }
  0xaf   : > { %p4850_p7 = pnand %p4848_p1, %p5808_p5 }
  0xb1   : > { %p4851_p8 = pneg %p4850_p7 }
  0xb3   : > { %p4856_p12 = pnand %p4854_p10, %p4851_p8 }
  0xb5   : > { %4859 = shalt.err (!%p4856_p12)
}
  0xb6   : > { %s4860_s30 = scalar_lea.vmem %s606_s28, 512  ;;  %p4868_p9 = scmp.lt.s32.totalorder %s606_s28, %s606_s28 }
  0xb7   : > { %p4861_p2 = scmp.ne.s32.totalorder %s606_s28, %s4860_s30  ;;  %p4869_p11 = scmp.lt.s32.totalorder %s4860_s30, %s4860_s30 }
  0xb9   : > { %p4863_p3 = pnand %p4861_p2, %p5808_p5  ;;  %p4870_p0 = por %p4869_p11, %p4868_p9 }
  0xbb   : > { %p4864_p6 = pneg %p4863_p3 }
  0xbd   : > { %p4871_p13 = pnand %p4870_p0, %p4864_p6 }
  0xbf   : > { %4874 = shalt.err (!%p4871_p13)
}
  0xc0   : > { %4394 = dma.hbm_to_vmem [thread:$0]  (!%p6853_p4), %s6857_s9, 512, %s606_s28, [#allocation20], %s6807_s27, %s6807_s27, %s6809_s18  }
  0xc1   : > { %s5548_s29 = smov [#allocation22]   ;;  %s5549_s26 = smov [#allocation25]  }
  0xc2   : > { %s629_s16 = sshll.u32 %s5548_s29, 4  ;;  %s654_s1 = sshll.u32 %s5549_s26, 4  ;;  %s630_s16 = int_to_ptr.vmem [resolvable:$true] %s629_s16  ;;  %s655_s1 = int_to_ptr.vmem [resolvable:$true] %s654_s1 }
  0xc3   : > { %s6858_s11 = sld [smem:[#allocation71_spill]] }
  0xc9   : > { %s4875_s19 = scalar_lea.hbm %s6858_s11, 512 }
  0xca   : > { %p4876_p1 = scmp.ne.s32.totalorder %s6858_s11, %s4875_s19  ;;  %p4882_p10 = scmp.lt.u32.totalorder %s4875_s19, %s6858_s11 }
  0xcc   : > { %p4878_p7 = pnand %p4876_p1, %p5808_p5 }
  0xce   : > { %p4879_p8 = pneg %p4878_p7 }
  0xd0   : > { %p4884_p12 = pnand %p4882_p10, %p4879_p8 }
  0xd2   : > { %4887 = shalt.err (!%p4884_p12)
}
  0xd3   : > { %s4888_s28 = scalar_lea.vmem %s630_s16, 512  ;;  %p4896_p9 = scmp.lt.s32.totalorder %s630_s16, %s630_s16 }
  0xd4   : > { %p4889_p2 = scmp.ne.s32.totalorder %s630_s16, %s4888_s28  ;;  %p4897_p11 = scmp.lt.s32.totalorder %s4888_s28, %s4888_s28 }
  0xd6   : > { %p4891_p3 = pnand %p4889_p2, %p5808_p5  ;;  %p4898_p0 = por %p4897_p11, %p4896_p9 }
  0xd8   : > { %p4892_p6 = pneg %p4891_p3 }
  0xda   : > { %p4899_p13 = pnand %p4898_p0, %p4892_p6 }
  0xdc   : > { %4902 = shalt.err (!%p4899_p13)
}
  0xdd   : > { %4400 = dma.hbm_to_vmem [thread:$0]  (!%p6853_p4), %s6858_s11, 512, %s630_s16, [#allocation23], %s6807_s27, %s6807_s27, %s6809_s18  }
  0xde   : > { %s6859_s13 = sld [smem:[#allocation73_spill]] }
  0xe4   : > { %s4903_s24 = scalar_lea.hbm %s6859_s13, 16 }
  0xe5   : > { %p4904_p1 = scmp.ne.s32.totalorder %s6859_s13, %s4903_s24  ;;  %p4910_p10 = scmp.lt.u32.totalorder %s4903_s24, %s6859_s13 }
  0xe7   : > { %p4906_p7 = pnand %p4904_p1, %p5808_p5 }
  0xe9   : > { %p4907_p8 = pneg %p4906_p7 }
  0xeb   : > { %p4912_p12 = pnand %p4910_p10, %p4907_p8 }
  0xed   : > { %4915 = shalt.err (!%p4912_p12)
}
  0xee   : > { %s4916_s21 = scalar_lea.vmem %s655_s1, 16  ;;  %s4923_s16 = scalar_lea.vmem %s655_s1, 32 }
  0xef   : > { %p4917_p2 = scmp.ne.s32.totalorder %s655_s1, %s4916_s21  ;;  %p4924_p9 = scmp.lt.s32.totalorder %s655_s1, %s655_s1 }
  0xf0   : > { %p4925_p11 = scmp.lt.s32.totalorder %s4923_s16, %s4916_s21 }
  0xf1   : > { %p4919_p3 = pnand %p4917_p2, %p5808_p5 }
  0xf2   : > { %p4926_p0 = por %p4925_p11, %p4924_p9 }
  0xf3   : > { %p4920_p6 = pneg %p4919_p3 }
  0xf5   : > { %p4927_p13 = pnand %p4926_p0, %p4920_p6 }
  0xf7   : > { %4930 = shalt.err (!%p4927_p13)
}
  0xf8   : > { %4406 = dma.hbm_to_vmem [thread:$0]  (!%p6853_p4), %s6859_s13, 16, %s655_s1, [#allocation26]  }
  0xf9   : > { %s5550_s22 = smov [#allocation28]   ;;  %s6860_s15 = sld [smem:[#allocation75_spill]] }
  0xfa   : > { %s675_s20 = sshll.u32 %s5550_s22, 4  ;;  %s676_s20 = int_to_ptr.vmem [resolvable:$true] %s675_s20 }
  0xff   : > { %s4931_s24 = scalar_lea.hbm %s6860_s15, 1024 }
 0x100   : > { %p4932_p1 = scmp.ne.s32.totalorder %s6860_s15, %s4931_s24  ;;  %p4938_p10 = scmp.lt.u32.totalorder %s4931_s24, %s6860_s15 }
 0x102   : > { %p4934_p7 = pnand %p4932_p1, %p5808_p5 }
 0x104   : > { %p4935_p8 = pneg %p4934_p7 }
 0x106   : > { %p4940_p12 = pnand %p4938_p10, %p4935_p8 }
 0x108   : > { %4943 = shalt.err (!%p4940_p12)
}
 0x109   : > { %s4944_s1 = scalar_lea.vmem %s676_s20, 1024  ;;  %p4952_p9 = scmp.lt.s32.totalorder %s676_s20, %s676_s20 }
 0x10a   : > { %p4945_p2 = scmp.ne.s32.totalorder %s676_s20, %s4944_s1  ;;  %p4953_p11 = scmp.lt.s32.totalorder %s4944_s1, %s4944_s1 }
 0x10c   : > { %p4947_p3 = pnand %p4945_p2, %p5808_p5  ;;  %p4954_p0 = por %p4953_p11, %p4952_p9 }
 0x10e   : > { %p4948_p6 = pneg %p4947_p3 }
 0x110   : > { %p4955_p13 = pnand %p4954_p0, %p4948_p6 }
 0x112   : > { %4958 = shalt.err (!%p4955_p13)
}
 0x113   : > { %s5551_s21 = smov 256   ;;  %s6861_s16 = smov 16  }
 0x114   : > { %4412 = dma.hbm_to_vmem [thread:$0]  (!%p6853_p4), %s6860_s15, 1024, %s676_s20, [#allocation29], %s5551_s21, %s5551_s21, %s6861_s16  }
 0x115   : > { %s5552_s22 = smov [#allocation31]   ;;  %s5553_s26 = smov [#allocation12]  }
 0x116   : > { %s699_s29 = sshll.u32 %s5552_s22, 4  ;;  %s547_s24 = sshll.u32 %s5553_s26, 4  ;;  %s700_s29 = int_to_ptr.vmem [resolvable:$true] %s699_s29  ;;  %s548_s24 = int_to_ptr.vmem [resolvable:$true] %s547_s24 }
 0x117   : > { %s4959_s0 = scalar_lea.hbm %s6772_s17, 4096 }
 0x118   : > { %p4960_p1 = scmp.ne.s32.totalorder %s6772_s17, %s4959_s0  ;;  %p4966_p10 = scmp.lt.u32.totalorder %s4959_s0, %s6772_s17 }
 0x11a   : > { %p4962_p7 = pnand %p4960_p1, %p5808_p5 }
 0x11c   : > { %p4963_p8 = pneg %p4962_p7 }
 0x11e   : > { %p4968_p12 = pnand %p4966_p10, %p4963_p8 }
 0x120   : > { %4971 = shalt.err (!%p4968_p12)
}
 0x121   : > { %s4972_s20 = scalar_lea.vmem %s700_s29, 4096  ;;  %p4980_p9 = scmp.lt.s32.totalorder %s700_s29, %s700_s29 }
 0x122   : > { %p4973_p2 = scmp.ne.s32.totalorder %s700_s29, %s4972_s20  ;;  %p4981_p11 = scmp.lt.s32.totalorder %s4972_s20, %s4972_s20 }
 0x124   : > { %p4975_p3 = pnand %p4973_p2, %p5808_p5  ;;  %p4982_p0 = por %p4981_p11, %p4980_p9 }
 0x126   : > { %p4976_p6 = pneg %p4975_p3 }
 0x128   : > { %p4983_p13 = pnand %p4982_p0, %p4976_p6 }
 0x12a   : > { %4986 = shalt.err (!%p4983_p13)
}
 0x12b   : > { %s6862_s21 = smov 128   ;;  %s6863_s4 = sld [smem:[#allocation64_spill]] }
 0x12c   : > { %4418 = dma.hbm_to_vmem [thread:$0]  (!%p6853_p4), %s6772_s17, 4096, %s700_s29, [#allocation32], %s6862_s21, %s6862_s21, %s6809_s18  }
 0x131   : > { %s4987_s26 = scalar_lea.hbm %s6863_s4, 16 }
 0x132   : > { %p4988_p1 = scmp.ne.s32.totalorder %s6863_s4, %s4987_s26  ;;  %p4994_p10 = scmp.lt.u32.totalorder %s4987_s26, %s6863_s4 }
 0x134   : > { %p4990_p7 = pnand %p4988_p1, %p5808_p5 }
 0x136   : > { %p4991_p8 = pneg %p4990_p7 }
 0x138   : > { %p4996_p12 = pnand %p4994_p10, %p4991_p8 }
 0x13a   : > { %4999 = shalt.err (!%p4996_p12)
}
 0x13b   : > { %s5000_s1 = scalar_lea.vmem %s548_s24, 16  ;;  %s5007_s29 = scalar_lea.vmem %s548_s24, 32 }
 0x13c   : > { %p5001_p2 = scmp.ne.s32.totalorder %s548_s24, %s5000_s1  ;;  %p5008_p9 = scmp.lt.s32.totalorder %s548_s24, %s548_s24 }
 0x13d   : > { %p5009_p11 = scmp.lt.s32.totalorder %s5007_s29, %s5000_s1 }
 0x13e   : > { %p5003_p3 = pnand %p5001_p2, %p5808_p5 }
 0x13f   : > { %p5010_p0 = por %p5009_p11, %p5008_p9 }
 0x140   : > { %p5004_p6 = pneg %p5003_p3 }
 0x142   : > { %p5011_p13 = pnand %p5010_p0, %p5004_p6 }
 0x144   : > { %5014 = shalt.err (!%p5011_p13)
}
 0x145   : > { %4379 = dma.hbm_to_vmem [thread:$0]  (!%p6853_p4), %s6863_s4, 16, %s548_s24, [#allocation11]  }
 0x146   : > { %s5554_s27 = smov [#allocation15]   ;;  %s5555_s28 = smov [#allocation18]  }
 0x147   : > { %s571_s16 = sshll.u32 %s5554_s27, 4  ;;  %s595_s22 = sshll.u32 %s5555_s28, 4  ;;  %s572_s16 = int_to_ptr.vmem [resolvable:$true] %s571_s16  ;;  %s596_s22 = int_to_ptr.vmem [resolvable:$true] %s595_s22 }
 0x148   : > { %s6864_s6 = sld [smem:[#allocation66_spill]] }
 0x14e   : > { %s5015_s19 = scalar_lea.hbm %s6864_s6, 16 }
 0x14f   : > { %p5016_p1 = scmp.ne.s32.totalorder %s6864_s6, %s5015_s19  ;;  %p5022_p10 = scmp.lt.u32.totalorder %s5015_s19, %s6864_s6 }
 0x151   : > { %p5018_p7 = pnand %p5016_p1, %p5808_p5 }
 0x153   : > { %p5019_p8 = pneg %p5018_p7 }
 0x155   : > { %p5024_p12 = pnand %p5022_p10, %p5019_p8 }
 0x157   : > { %5027 = shalt.err (!%p5024_p12)
}
 0x158   : > { %s5028_s24 = scalar_lea.vmem %s572_s16, 16  ;;  %s5035_s30 = scalar_lea.vmem %s572_s16, 32 }
 0x159   : > { %p5029_p2 = scmp.ne.s32.totalorder %s572_s16, %s5028_s24  ;;  %p5036_p9 = scmp.lt.s32.totalorder %s572_s16, %s572_s16 }
 0x15a   : > { %p5037_p11 = scmp.lt.s32.totalorder %s5035_s30, %s5028_s24 }
 0x15b   : > { %p5031_p3 = pnand %p5029_p2, %p5808_p5 }
 0x15c   : > { %p5038_p0 = por %p5037_p11, %p5036_p9 }
 0x15d   : > { %p5032_p6 = pneg %p5031_p3 }
 0x15f   : > { %p5039_p13 = pnand %p5038_p0, %p5032_p6 }
 0x161   : > { %5042 = shalt.err (!%p5039_p13)
}
 0x162   : > { %4385 = dma.hbm_to_vmem [thread:$0]  (!%p6853_p4), %s6864_s6, 16, %s572_s16, [#allocation14]  }
 0x163   : > { %s6865_s8 = sld [smem:[#allocation68_spill]] }
 0x169   : > { %s5043_s25 = scalar_lea.hbm %s6865_s8, 16 }
 0x16a   : > { %p5044_p1 = scmp.ne.s32.totalorder %s6865_s8, %s5043_s25  ;;  %p5050_p10 = scmp.lt.u32.totalorder %s5043_s25, %s6865_s8 }
 0x16c   : > { %p5046_p7 = pnand %p5044_p1, %p5808_p5 }
 0x16e   : > { %p5047_p8 = pneg %p5046_p7 }
 0x170   : > { %p5052_p12 = pnand %p5050_p10, %p5047_p8 }
 0x172   : > { %5055 = shalt.err (!%p5052_p12)
}
 0x173   : > { %s5056_s29 = scalar_lea.vmem %s596_s22, 16  ;;  %s5063_s16 = scalar_lea.vmem %s596_s22, 32 }
 0x174   : > { %p5057_p2 = scmp.ne.s32.totalorder %s596_s22, %s5056_s29  ;;  %p5064_p9 = scmp.lt.s32.totalorder %s596_s22, %s596_s22 }
 0x175   : > { %p5065_p11 = scmp.lt.s32.totalorder %s5063_s16, %s5056_s29 }
 0x176   : > { %p5059_p3 = pnand %p5057_p2, %p5808_p5 }
 0x177   : > { %p5066_p0 = por %p5065_p11, %p5064_p9 }
 0x178   : > { %p5060_p6 = pneg %p5059_p3 }
 0x17a   : > { %p5067_p13 = pnand %p5066_p0, %p5060_p6 }
 0x17c   : > { %5070 = shalt.err (!%p5067_p13)
}
 0x17d   : > { %4391 = dma.hbm_to_vmem [thread:$0]  (!%p6853_p4), %s6865_s8, 16, %s596_s22, [#allocation17]  }
 0x17e   : > { %s5556_s20 = smov [#allocation21]   ;;  %s5557_s28 = smov [#allocation24]  }
 0x17f   : > { %s619_s27 = sshll.u32 %s5556_s20, 4  ;;  %s643_s26 = sshll.u32 %s5557_s28, 4  ;;  %s620_s27 = int_to_ptr.vmem [resolvable:$true] %s619_s27  ;;  %s644_s26 = int_to_ptr.vmem [resolvable:$true] %s643_s26 }
 0x180   : > { %s6866_s10 = sld [smem:[#allocation70_spill]] }
 0x186   : > { %s5071_s0 = scalar_lea.hbm %s6866_s10, 16 }
 0x187   : > { %p5072_p1 = scmp.ne.s32.totalorder %s6866_s10, %s5071_s0  ;;  %p5078_p10 = scmp.lt.u32.totalorder %s5071_s0, %s6866_s10 }
 0x189   : > { %p5074_p7 = pnand %p5072_p1, %p5808_p5 }
 0x18b   : > { %p5075_p8 = pneg %p5074_p7 }
 0x18d   : > { %p5080_p12 = pnand %p5078_p10, %p5075_p8 }
 0x18f   : > { %5083 = shalt.err (!%p5080_p12)
}
 0x190   : > { %s5084_s22 = scalar_lea.vmem %s620_s27, 16  ;;  %s5091_s24 = scalar_lea.vmem %s620_s27, 32 }
 0x191   : > { %p5085_p2 = scmp.ne.s32.totalorder %s620_s27, %s5084_s22  ;;  %p5092_p9 = scmp.lt.s32.totalorder %s620_s27, %s620_s27 }
 0x192   : > { %p5093_p11 = scmp.lt.s32.totalorder %s5091_s24, %s5084_s22 }
 0x193   : > { %p5087_p3 = pnand %p5085_p2, %p5808_p5 }
 0x194   : > { %p5094_p0 = por %p5093_p11, %p5092_p9 }
 0x195   : > { %p5088_p6 = pneg %p5087_p3 }
 0x197   : > { %p5095_p13 = pnand %p5094_p0, %p5088_p6 }
 0x199   : > { %5098 = shalt.err (!%p5095_p13)
}
 0x19a   : > { %4397 = dma.hbm_to_vmem [thread:$0]  (!%p6853_p4), %s6866_s10, 16, %s620_s27, [#allocation20]  }
 0x19b   : > { %s6867_s12 = sld [smem:[#allocation72_spill]] }
 0x1a1   : > { %s5099_s19 = scalar_lea.hbm %s6867_s12, 16 }
 0x1a2   : > { %p5100_p1 = scmp.ne.s32.totalorder %s6867_s12, %s5099_s19  ;;  %p5106_p10 = scmp.lt.u32.totalorder %s5099_s19, %s6867_s12 }
 0x1a4   : > { %p5102_p7 = pnand %p5100_p1, %p5808_p5 }
 0x1a6   : > { %p5103_p8 = pneg %p5102_p7 }
 0x1a8   : > { %p5108_p12 = pnand %p5106_p10, %p5103_p8 }
 0x1aa   : > { %5111 = shalt.err (!%p5108_p12)
}
 0x1ab   : > { %s5112_s16 = scalar_lea.vmem %s644_s26, 16  ;;  %s5119_s27 = scalar_lea.vmem %s644_s26, 32 }
 0x1ac   : > { %p5113_p2 = scmp.ne.s32.totalorder %s644_s26, %s5112_s16  ;;  %p5120_p9 = scmp.lt.s32.totalorder %s644_s26, %s644_s26 }
 0x1ad   : > { %p5121_p11 = scmp.lt.s32.totalorder %s5119_s27, %s5112_s16 }
 0x1ae   : > { %p5115_p3 = pnand %p5113_p2, %p5808_p5 }
 0x1af   : > { %p5122_p0 = por %p5121_p11, %p5120_p9 }
 0x1b0   : > { %p5116_p6 = pneg %p5115_p3 }
 0x1b2   : > { %p5123_p13 = pnand %p5122_p0, %p5116_p6 }
 0x1b4   : > { %5126 = shalt.err (!%p5123_p13)
}
 0x1b5   : > { %4403 = dma.hbm_to_vmem [thread:$0]  (!%p6853_p4), %s6867_s12, 16, %s644_s26, [#allocation23]  }
 0x1b6   : > { %s5558_s30 = smov [#allocation27]   ;;  %s5559_s28 = smov [#allocation30]  }
 0x1b7   : > { %s665_s20 = sshll.u32 %s5558_s30, 4  ;;  %s689_s25 = sshll.u32 %s5559_s28, 4  ;;  %s666_s20 = int_to_ptr.vmem [resolvable:$true] %s665_s20  ;;  %s690_s25 = int_to_ptr.vmem [resolvable:$true] %s689_s25 }
 0x1b8   : > { %s6868_s14 = sld [smem:[#allocation74_spill]] }
 0x1be   : > { %s5127_s23 = scalar_lea.hbm %s6868_s14, 16 }
 0x1bf   : > { %p5128_p1 = scmp.ne.s32.totalorder %s6868_s14, %s5127_s23  ;;  %p5134_p10 = scmp.lt.u32.totalorder %s5127_s23, %s6868_s14 }
 0x1c1   : > { %p5130_p7 = pnand %p5128_p1, %p5808_p5 }
 0x1c3   : > { %p5131_p8 = pneg %p5130_p7 }
 0x1c5   : > { %p5136_p12 = pnand %p5134_p10, %p5131_p8 }
 0x1c7   : > { %5139 = shalt.err (!%p5136_p12)
}
 0x1c8   : > { %s5140_s26 = scalar_lea.vmem %s666_s20, 16  ;;  %s5147_s22 = scalar_lea.vmem %s666_s20, 32 }
 0x1c9   : > { %p5141_p2 = scmp.ne.s32.totalorder %s666_s20, %s5140_s26  ;;  %p5148_p9 = scmp.lt.s32.totalorder %s666_s20, %s666_s20 }
 0x1ca   : > { %p5149_p11 = scmp.lt.s32.totalorder %s5147_s22, %s5140_s26 }
 0x1cb   : > { %p5143_p3 = pnand %p5141_p2, %p5808_p5 }
 0x1cc   : > { %p5150_p0 = por %p5149_p11, %p5148_p9 }
 0x1cd   : > { %p5144_p6 = pneg %p5143_p3 }
 0x1cf   : > { %p5151_p13 = pnand %p5150_p0, %p5144_p6 }
 0x1d1   : > { %5154 = shalt.err (!%p5151_p13)
}
 0x1d2   : > { %4409 = dma.hbm_to_vmem [thread:$0]  (!%p6853_p4), %s6868_s14, 16, %s666_s20, [#allocation26]  }
 0x1d3   : > { %s6869_s0 = sld [smem:[#allocation76_spill]] }
 0x1d9   : > { %s6870_s29 = smov %s6869_s0  ;;  %s5155_s23 = scalar_lea.hbm %s6869_s0, 32 }
 0x1da   : > { %p5156_p1 = scmp.ne.s32.totalorder %s6870_s29, %s5155_s23  ;;  %p5162_p10 = scmp.lt.u32.totalorder %s5155_s23, %s6870_s29 }
 0x1dc   : > { %p5158_p7 = pnand %p5156_p1, %p5808_p5 }
 0x1de   : > { %p5159_p8 = pneg %p5158_p7 }
 0x1e0   : > { %p5164_p12 = pnand %p5162_p10, %p5159_p8 }
 0x1e2   : > { %5167 = shalt.err (!%p5164_p12)
}
 0x1e3   : > { %s5168_s22 = scalar_lea.vmem %s690_s25, 32  ;;  %p5176_p9 = scmp.lt.s32.totalorder %s690_s25, %s690_s25 }
 0x1e4   : > { %p5169_p2 = scmp.ne.s32.totalorder %s690_s25, %s5168_s22  ;;  %p5177_p11 = scmp.lt.s32.totalorder %s5168_s22, %s5168_s22 }
 0x1e6   : > { %p5171_p3 = pnand %p5169_p2, %p5808_p5  ;;  %p5178_p0 = por %p5177_p11, %p5176_p9 }
 0x1e8   : > { %p5172_p6 = pneg %p5171_p3 }
 0x1ea   : > { %p5179_p13 = pnand %p5178_p0, %p5172_p6 }
 0x1ec   : > { %5182 = shalt.err (!%p5179_p13)
}
 0x1ed   : > { %4415 = dma.hbm_to_vmem [thread:$0]  (!%p6853_p4), %s6870_s29, 32, %s690_s25, [#allocation29]  }
 0x1ee   : > { %s5560_s30 = smov [#allocation33]   ;;  %s6871_s23 = sld [smem:[#allocation77_spill]] }
 0x1ef   : > { %s713_s28 = sshll.u32 %s5560_s30, 4  ;;  %s714_s28 = int_to_ptr.vmem [resolvable:$true] %s713_s28 }
 0x1f4   : > { %s6872_s16 = smov %s6871_s23  ;;  %s5183_s1 = scalar_lea.hbm %s6871_s23, 16 }
 0x1f5   : > { %p5184_p1 = scmp.ne.s32.totalorder %s6872_s16, %s5183_s1  ;;  %p5190_p10 = scmp.lt.u32.totalorder %s5183_s1, %s6872_s16 }
 0x1f7   : > { %p5186_p7 = pnand %p5184_p1, %p5808_p5 }
 0x1f9   : > { %p5187_p8 = pneg %p5186_p7 }
 0x1fb   : > { %p5192_p12 = pnand %p5190_p10, %p5187_p8 }
 0x1fd   : > { %5195 = shalt.err (!%p5192_p12)
}
 0x1fe   : > { %s5196_s25 = scalar_lea.vmem %s714_s28, 16  ;;  %s5203_s20 = scalar_lea.vmem %s714_s28, 32 }
 0x1ff   : > { %p5197_p2 = scmp.ne.s32.totalorder %s714_s28, %s5196_s25  ;;  %p5204_p9 = scmp.lt.s32.totalorder %s714_s28, %s714_s28 }
 0x200   : > { %p5205_p11 = scmp.lt.s32.totalorder %s5203_s20, %s5196_s25 }
 0x201   : > { %p5199_p3 = pnand %p5197_p2, %p5808_p5 }
 0x202   : > { %p5206_p0 = por %p5205_p11, %p5204_p9 }
 0x203   : > { %p5200_p6 = pneg %p5199_p3 }
 0x205   : > { %p5207_p13 = pnand %p5206_p0, %p5200_p6 }
 0x207   : > { %5210 = shalt.err (!%p5207_p13)
}
 0x208   : > { %s6873_s18 = sld [smem:[#allocation56_spill]]  ;;  %s6874_s19 = sld [smem:[#allocation54_spill]] }
 0x209   : > { %s6875_s0 = sld [smem:[#allocation55_spill]]  ;;  %s6876_s23 = sld [smem:[#allocation51_spill]] }
 0x20a   : > { %s6877_s1 = sld [smem:[#allocation50_spill]]  ;;  %s6878_s3 = sld [smem:[#allocation49_spill]] }
 0x20b   : > { %s6879_s27 = sld [smem:[#allocation48_spill]]  ;;  %s6880_s2 = sld [smem:[#allocation57_spill]] }
 0x20c   : > { %4421 = dma.hbm_to_vmem [thread:$0]  (!%p6853_p4), %s6872_s16, 16, %s714_s28, [#allocation32]  }
 0x20d   : > { %s6881_s22 = sld [smem:[#allocation47_spill]]  ;;  %s6888_s15 = sld [smem:[#allocation60_spill]] }
 0x20e   : > { %s3862_s26 = sadd.s32 4294967294, %s6873_s18   ;;  %s55_s25 = sadd.s32 1, %s6874_s19 }
 0x20f   : > { %p56_p5 = scmp.ge.s32.totalorder %s55_s25, 2  ;;  %s58_s20 = sadd.s32 1, %s6875_s0 }
 0x210   : > { %s67_s24 = sadd.s32 1, %s6876_s23  ;;  %p74_p1 = scmp.ne.s32.totalorder %s6876_s23, %s6877_s1 }
 0x211   : > { %s6952_s25 = smov (%p56_p5, %s55_s25), 0  ;;  %s6954_s20 = smov (!%p56_p5, %s58_s20), %s6875_s0 }
 0x212   : > { %s63_s28 = ssub.s32 %s6874_s19, %s6952_s25  ;;  %p75_p4 = scmp.eq.s32.totalorder %s6873_s18, 0 }
 0x213   : > { %p60_p7 = scmp.ge.s32.totalorder %s6954_s20, 2  ;;  %p80_p8 = scmp.ne.s32.totalorder %s6877_s1, %s6878_s3 }
 0x214   : > { %p6129_p10 = por %p75_p4, %p74_p1  ;;  %s93_s4 = sadd.s32 1, %s6879_s27 }
 0x215   : > { %s6956_s20 = smov (%p60_p7, %s6954_s20), 0  ;;  %p6883_p12 = scmp.eq.s32.totalorder %s6880_s2, 0 }
 0x216   : > { %p100_p3 = scmp.ne.s32.totalorder %s6879_s27, %s6881_s22  ;;  %s62_s6 = ssub.s32 %s6875_s0, %s6956_s20 }
 0x217   : > { %p6141_p2 = por %p6883_p12, %p80_p8  ;;  %p494_p6 = scmp.eq.s32.totalorder %s6880_s2, 3 }
 0x218   : > { %s64_s7 = sor.u32 %s63_s28, %s62_s6  ;;  %p91_p9 = scmp.eq.s32.totalorder %s62_s6, 0 }
 0x219   : > { %s6884_s5 = scalar_select %p6141_p2, 1, 0 }
 0x21a   : > { %p65_p11 = scmp.eq.s32.totalorder %s64_s7, 0  ;;  %p6152_p0 = por %p100_p3, %p75_p4 }
 0x21b   : > { %s6157_s9 = scalar_select %p91_p9, %s6879_s27, %s93_s4  }
 0x21c   : > { %s6160_s10 = scalar_select %p65_p11, %s6876_s23, %s67_s24  }
 0x21d   : > { %p6165_p13 = por %p494_p6, %p74_p1  ;;  %p500_p5 = scmp.eq.s32.totalorder %s3862_s26, 3 }
 0x21e   : > { %p4449_p7 = scmp.lt.s32.totalorder %s6873_s18, 4  ;;  %s724_s6 = sand.u32 1, %s6876_s23  }
 0x21f   : > { %s6886_s22 = scalar_select %p6165_p13, 1, 0 }
 0x220   : > { %p6174_p4 = por %p500_p5, %p80_p8  ;;  %s3883_s4 = sshll.u32 %s724_s6, 3 }
 0x221   : > { %s3884_s2 = sshll.u32 %s6875_s0, 1  ;;  %s728_s11 = scalar_lea.vmem [#allocation4], %s3883_s4 }
 0x222   : > { %s6887_s7 = scalar_select %p6174_p4, 1, 0 }
 0x223   : > { %s733_s28 = sadd.s32 %s6874_s19, %s3884_s2  ;;  %s737_s12 = sshll.u32 %s728_s11, 4  ;;  %s6185_s12 = int_to_ptr.vmem [resolvable:$true] %s737_s12 }
 0x224   : > { %s3885_s24 = sshll.u32 %s733_s28, 7  ;;  %p6189_p1 = pnand %p4449_p7, %p6129_p10 }
 0x225   : > { %s6183_s16 = scalar_lea.hbm %s6888_s15, %s3885_s24  ;;  %p6195_p8 = pnand %p4449_p7, %p6152_p0 }
 0x226   : > { %s744_s13 = sand.u32 1, %s6873_s18   ;;  %s746_s14 = sand.u32 1, %s6879_s27  }
 0x227   : > { %s725_s19 = scalar_lea.sflag [#allocation5], %s724_s6  ;;  %s5211_s1 = scalar_lea.hbm %s6183_s16, 128 }
 0x228   : > { %p5212_p12 = scmp.ne.s32.totalorder %s6183_s16, %s5211_s1  ;;  %p5213_p3 = pneg %p6189_p1 }
 0x229   : > { %s5216_s8 = scalar_lea.hbm %s6888_s15, 512  ;;  %p5217_p9 = scmp.lt.u32.totalorder %s6183_s16, %s6888_s15 }
 0x22a   : > { %p5214_p10 = pnand %p5213_p3, %p5212_p12  ;;  %p5218_p11 = scmp.lt.u32.totalorder %s5216_s8, %s5211_s1 }
 0x22b   : > { %p5220_p5 = scmp.lt.u32.totalorder %s5211_s1, %s6183_s16 }
 0x22c   : > { %p5215_p6 = pneg %p5214_p10  ;;  %p5219_p0 = por %p5218_p11, %p5217_p9 }
 0x22e   : > { %p5221_p7 = por %p5220_p5, %p5219_p0 }
 0x230   : > { %p5222_p4 = pnand %p5221_p7, %p5215_p6 }
 0x232   : > { %5225 = shalt.err (!%p5222_p4)
}
 0x233   : > { %s5226_s6 = scalar_lea.vmem %s6185_s12, 128  ;;  %s5561_s2 = smov [#allocation4]  }
 0x234   : > { %p5227_p12 = scmp.ne.s32.totalorder %s6185_s12, %s5226_s6  ;;  %s5231_s28 = sshll.u32 %s5561_s2, 4  ;;  %s5232_s28 = int_to_ptr.vmem [resolvable:$false] %s5231_s28 }
 0x235   : > { %s5233_s24 = scalar_lea.vmem %s5232_s28, 256  ;;  %p5234_p2 = scmp.lt.s32.totalorder %s6185_s12, %s5232_s28 }
 0x236   : > { %p5229_p10 = pnand %p5227_p12, %p5213_p3  ;;  %p5235_p9 = scmp.lt.s32.totalorder %s5233_s24, %s5226_s6 }
 0x238   : > { %p5230_p13 = pneg %p5229_p10  ;;  %p5236_p11 = por %p5235_p9, %p5234_p2 }
 0x23a   : > { %p5237_p0 = pnand %p5236_p11, %p5230_p13 }
 0x23c   : > { %5240 = shalt.err (!%p5237_p0)
}
 0x23d   : > { %4425 = dma.hbm_to_vmem [thread:$0]  (!%p6189_p1), %s6183_s16, 128, %s6185_s12, %s725_s19  }
 0x23e   : > { %s3886_s1 = sshll.u32 %s746_s14, 4  ;;  %s3951_s3 = sshll.u32 %s6875_s0, 8 }
 0x23f   : > { %s6891_s30 = sld [smem:[#allocation61_spill]]  ;;  %s748_s23 = scalar_lea.vmem [#allocation7], %s3886_s1 }
 0x240   : > { %s755_s2 = sshll.u32 %s748_s23, 4  ;;  %s6238_s28 = scalar_lea.sflag [#allocation8], %s744_s13  ;;  %s6234_s2 = int_to_ptr.vmem [resolvable:$true] %s755_s2 }
 0x241   : > { %p5243_p13 = pneg %p6195_p8 }
 0x245   : > { %s6892_s4 = smov %s6891_s30  ;;  %s6232_s6 = scalar_lea.hbm %s6891_s30, %s3951_s3 }
 0x246   : > { %s5241_s12 = scalar_lea.hbm %s6232_s6, 256  ;;  %s5246_s27 = scalar_lea.hbm %s6892_s4, 512 }
 0x247   : > { %p5242_p2 = scmp.ne.s32.totalorder %s6232_s6, %s5241_s12  ;;  %p5247_p3 = scmp.lt.u32.totalorder %s6232_s6, %s6892_s4 }
 0x248   : > { %p5248_p6 = scmp.lt.u32.totalorder %s5246_s27, %s5241_s12  ;;  %p5250_p7 = scmp.lt.u32.totalorder %s5241_s12, %s6232_s6 }
 0x249   : > { %p5244_p4 = pnand %p5243_p13, %p5242_p2 }
 0x24a   : > { %p5249_p5 = por %p5248_p6, %p5247_p3 }
 0x24b   : > { %p5245_p1 = pneg %p5244_p4 }
 0x24c   : > { %p5251_p12 = por %p5250_p7, %p5249_p5 }
 0x24e   : > { %p5252_p10 = pnand %p5251_p12, %p5245_p1 }
 0x250   : > { %5255 = shalt.err (!%p5252_p10)
}
 0x251   : > { %s5256_s18 = scalar_lea.vmem %s6234_s2, 256  ;;  %s5562_s13 = smov [#allocation7]  }
 0x252   : > { %p5257_p9 = scmp.ne.s32.totalorder %s6234_s2, %s5256_s18  ;;  %s5261_s24 = sshll.u32 %s5562_s13, 4  ;;  %s5262_s24 = int_to_ptr.vmem [resolvable:$false] %s5261_s24 }
 0x253   : > { %s5263_s1 = scalar_lea.vmem %s5262_s24, 512  ;;  %p5264_p2 = scmp.lt.s32.totalorder %s6234_s2, %s5262_s24 }
 0x254   : > { %p5259_p11 = pnand %p5257_p9, %p5243_p13  ;;  %p5265_p4 = scmp.lt.s32.totalorder %s5263_s1, %s5256_s18 }
 0x256   : > { %p5260_p0 = pneg %p5259_p11  ;;  %p5266_p3 = por %p5265_p4, %p5264_p2 }
 0x258   : > { %p5267_p6 = pnand %p5266_p3, %p5260_p0 }
 0x25a   : > { %5270 = shalt.err (!%p5267_p6)
}
 0x25b   : > { %s6893_s3 = smov 8   ;;  %s6894_s26 = sld [smem:[#allocation59_spill]] }
 0x25c   : > { %4428 = dma.hbm_to_vmem [thread:$0]  (!%p6195_p8), %s6232_s6, 256, %s6234_s2, %s6238_s28, %s6862_s21, %s6862_s21, %s6893_s3  }
 0x261   : > { %p6895_p13 = scmp.ne.s32.totalorder %s6894_s26, 0 }
 0x262   : > { %s6896_s8 = sld [smem:[#allocation50_spill]] (!%p6895_p13)  ;;  %p6897_p1 = scmp.ne.s32.totalorder (!%p6895_p13), %s6884_s5, 0 }
 0x263   : > { %767 = sbr.rel (%p6895_p13) target bundleno = 4081 (0xff1), region = 96 }
 0x268   : > { %s6272_s30 = sand.u32 (!%p6895_p13), 1, %s6896_s8  }
 0x269   : > { %s3890_s23 = sshll.u32 (!%p6895_p13), %s6272_s30, 3  ;;  %s770_s12 = scalar_lea.sflag (!%p6895_p13), [#allocation5], %s6272_s30 }
 0x26a   : > { %s6276_s16 = scalar_lea.vmem [#allocation4], %s3890_s23 }
 0x26b   : > { %5396 = dma.done.wait (%p6897_p1), %s770_s12, 128  }
 0x26c   : > { %5398 = vsyncadd (%p6897_p1), %s770_s12, 4294967168  ;;  %s6898_s11 = sld [smem:[#allocation57_spill]]  ;;  %s6899_s21 = sld [smem:[#allocation47_spill]] }
 0x26d   : > { %s6900_s6 = sld [smem:[#allocation58_spill]] }
 0x272   : > { %s778_s2 = sand.u32 1, %s6898_s11   ;;  %s780_s28 = sand.u32 1, %s6899_s21  }
 0x273   : > { %s3891_s0 = sshll.u32 %s780_s28, 4  ;;  %s779_s27 = scalar_lea.sflag [#allocation8], %s778_s2 }
 0x274   : > { %s782_s14 = scalar_lea.vmem [#allocation7], %s3891_s0  ;;  %p6901_p8 = scmp.ne.s32.totalorder %s6900_s6, 0 }
 0x276   : > { %5400 = dma.done.wait (%p6901_p8), %s779_s27, 256  }
 0x277   : > { %5402 = vsyncadd (%p6901_p8), %s779_s27, 4294967040 }
 0x278   : > { %5404 = dma.done.wait (%p6901_p8), [#allocation8], 32  }
 0x279   : > { %5406 = vsyncadd (%p6901_p8), [#allocation8], 4294967264  ;;  %p6902_p5 = scmp.eq.s32.totalorder %s6898_s11, 0 }
 0x27b   : > { %5408 = dma.done.wait (%p6902_p5), [#allocation11], 32   ;;  %p6903_p7 = pmov %p6902_p5 }
 0x27c   : > { %p6904_p12 = pmov %p6902_p5 }
 0x27d   : > { %5410 = vsyncadd (%p6903_p7), [#allocation11], 4294967264 }
 0x27e   : > { %5412 = dma.done.wait (%p6904_p12), [#allocation14], 528   ;;  %p6905_p10 = pmov %p6902_p5 }
 0x27f   : > { %p6906_p9 = pmov %p6902_p5 }
 0x280   : > { %5414 = vsyncadd (%p6905_p10), [#allocation14], 4294966768 }
 0x281   : > { %5416 = dma.done.wait (%p6906_p9), [#allocation17], 528   ;;  %p6907_p11 = pmov %p6902_p5 }
 0x282   : > { %p6908_p0 = pmov %p6902_p5 }
 0x283   : > { %5418 = vsyncadd (%p6907_p11), [#allocation17], 4294966768 }
 0x284   : > { %5420 = dma.done.wait (%p6908_p0), [#allocation20], 528   ;;  %p6909_p2 = pmov %p6908_p0 }
 0x285   : > { %p6910_p4 = pmov %p6908_p0 }
 0x286   : > { %5422 = vsyncadd (%p6909_p2), [#allocation20], 4294966768 }
 0x287   : > { %5424 = dma.done.wait (%p6910_p4), [#allocation23], 528   ;;  %p6911_p3 = pmov %p6908_p0 }
 0x288   : > { %p6912_p6 = pmov %p6908_p0 }
 0x289   : > { %5426 = vsyncadd (%p6911_p3), [#allocation23], 4294966768 }
 0x28a   : > { %5428 = dma.done.wait (%p6912_p6), [#allocation26], 32   ;;  %p6913_p13 = pmov %p6908_p0 }
 0x28b   : > { %p6914_p1 = pmov %p6908_p0 }
 0x28c   : > { %5430 = vsyncadd (%p6913_p13), [#allocation26], 4294967264 }
 0x28d   : > { %5432 = dma.done.wait (%p6914_p1), [#allocation29], 1056   ;;  %p6915_p8 = pmov %p6908_p0 }
 0x28e   : > { %p6916_p5 = pmov %p6908_p0 }
 0x28f   : > { %5434 = vsyncadd (%p6915_p8), [#allocation29], 4294966240 }
 0x290   : > { %5436 = dma.done.wait (%p6916_p5), [#allocation32], 4112   ;;  %p6917_p7 = pmov %p6908_p0 }
 0x291   : > { %s6324_s5 = scalar_lea.vmem [#allocation34], %s3890_s23  ;;  %s6918_s19 = sld [smem:[#allocation52_spill]] }
 0x292   : > { %5438 = vsyncadd (%p6917_p7), [#allocation32], 4294963184 }
 0x297   : > { %p3909_p12 = scmp.ne.s32.totalorder %s6918_s19, 0 }
 0x298   : > { %v914_v0 = vld [vmem:[%s782_s14] sm:$0xff] (!%p3909_p12)  ;;  %vm918_vm0 = vcmask (!%p3909_p12), 261120   ;;  %v915_v1 = vld [vmem:[%s782_s14 + $0x8] sm:$0xff] (!%p3909_p12) }
 0x299   : > { %913 = sbr.rel (%p3909_p12) target bundleno = 1198 (0x4ae), region = 176  ;;  %v919_v2 = vsel (!%p3909_p12), %vm918_vm0, %v914_v0, 0.0  ;;  %v922_v3 = vsel (!%p3909_p12), %vm918_vm0, %v915_v1, 0.0  ;;  %v962_v14 = vld [vmem:[#allocation16] sm:$0xff] (!%p3909_p12)  ;;  %v963_v15 = vld [vmem:[#allocation16 + $0x8] sm:$0xff] (!%p3909_p12)  ;;  %v964_v19 = vld [vmem:[#allocation16 + $0x10] sm:$0xff] (!%p3909_p12) }
 0x29a   : > { %920 = vadd.xlane.f32.xlu0 (!%p3909_p12), %v919_v2  ;;  %v1054_v16 = vld [vmem:[#allocation19] sm:$0xff] (!%p3909_p12)  ;;  %v4210_v17 = vpack.c.bf16 (!%p3909_p12), %v963_v15, %v962_v14  ;;  %v1055_v18 = vld [vmem:[#allocation19 + $0x8] sm:$0xff] (!%p3909_p12)  ;;  %v965_v20 = vld [vmem:[#allocation16 + $0x18] sm:$0xff] (!%p3909_p12) }
 0x29b   : > { %v4218_v21 = vpack.c.bf16 (!%p3909_p12), %v1055_v18, %v1054_v16  ;;  %v4214_v22 = vpack.c.bf16 (!%p3909_p12), %v965_v20, %v964_v19  ;;  %v1056_v23 = vld [vmem:[#allocation19 + $0x10] sm:$0xff] (!%p3909_p12)  ;;  %v1057_v24 = vld [vmem:[#allocation19 + $0x18] sm:$0xff] (!%p3909_p12)  ;;  %v3915_v43 = vld [vmem:[#allocation21] ss:$0 sm:$0xff] (!%p3909_p12) }
 0x29c   : > { %4211 = vmatprep.subr.bf16.mxu0 (!%p3909_p12), %v4210_v17  ;;  %v4222_v25 = vpack.c.bf16 (!%p3909_p12), %v1057_v24, %v1056_v23  ;;  %v3910_v33 = vld [vmem:[#allocation10] ss:$0 sm:$0xff] (!%p3909_p12)  ;;  %v3911_v35 = vld [vmem:[#allocation12] ss:$0 sm:$0xff] (!%p3909_p12)  ;;  %v3912_v42 = vld [vmem:[#allocation18] ss:$0 sm:$0xff] (!%p3909_p12) }
 0x29d   : > { %4219 = vmatprep.subr.bf16.mxu1 (!%p3909_p12), %v4218_v21  ;;  %4213 = vmatpush3.bf16.msra.mxu0 (!%p3909_p12), %v4210_v17 }
 0x29e   : > { %923 = vadd.xlane.f32.xlu0 (!%p3909_p12), %v922_v3  ;;  %4221 = vmatpush3.bf16.msra.mxu1 (!%p3909_p12), %v4218_v21 }
 0x29f   : > { %4215 = vmatprep.subr.bf16.mxu0 (!%p3909_p12), %v4214_v22  ;;  %4223 = vmatprep.subr.bf16.mxu1 (!%p3909_p12), %v4222_v25 }
 0x2a1   : > { %4217 = vmatpush3.bf16.msra.mxu0 %v4214_v22 }
 0x2a2   : > { %4225 = vmatpush3.bf16.msra.mxu1 %v4222_v25 }
 0x327   : > { %v921_v4 = vpop.xlane.xlu0 %920 }
 0x328   : > { %v926_v5 = vmul.f32 0.03125, %v921_v4 }
 0x32a   : > { %v928_v6 = vsub.f32 %v914_v0, %v926_v5 }
 0x32b   : > { %v924_v7 = vpop.xlane.xlu0 %923 }
 0x32c   : > { %v927_v8 = vmul.f32 0.03125, %v924_v7  ;;  %v930_v9 = vmul.f32 %v928_v6, %v928_v6 }
 0x32e   : > { %v929_v10 = vsub.f32 %v915_v1, %v927_v8  ;;  %v932_v11 = vsel %vm918_vm0, %v930_v9, 0.0 }
 0x32f   : > { %933 = vadd.xlane.f32.xlu1 %v932_v11 }
 0x330   : > { %v931_v12 = vmul.f32 %v929_v10, %v929_v10 }
 0x332   : > { %v935_v13 = vsel %vm918_vm0, %v931_v12, 0.0 }
 0x333   : > { %936 = vadd.xlane.f32.xlu1 %v935_v13 }
 0x3bc   : > { %v934_v26 = vpop.xlane.xlu1 %933 }
 0x3bd   : > { %v938_v27 = vmul.f32 0.03125, %v934_v26 }
 0x3bf   : > { %v940_v28 = vadd.f32 1e-06, %v938_v27 }
 0x3c0   : > { %v937_v29 = vpop.xlane.xlu1 %936 }
 0x3c1   : > { %4697 = vrsqrt.f32 %v940_v28  ;;  %v939_v30 = vmul.f32 0.03125, %v937_v29 }
 0x3c3   : > { %v941_v31 = vadd.f32 1e-06, %v939_v30 }
 0x3c5   : > { %4699 = vrsqrt.f32 %v941_v31 }
 0x3cb   : > { %v4698_v32 = vpop.eup %4697 }
 0x3cc   : > { %v944_v34 = vmul.f32 %v4698_v32, %v928_v6 }
 0x3ce   : > { %v952_v36 = vmul.f32 %v3910_v33, %v944_v34 }
 0x3cf   : > { %v4700_v37 = vpop.eup %4699 }
 0x3d0   : > { %v945_v38 = vmul.f32 %v4700_v37, %v929_v10  ;;  %v960_v39 = vadd.f32 %v3911_v35, %v952_v36 }
 0x3d2   : > { %v953_v40 = vmul.f32 %v3910_v33, %v945_v38  ;;  %4042 = vmatprep.mubr.msk.f32.mxu0 %vm918_vm0, %v960_v39  ;;  %4053 = vmatprep.mubr.msk.f32.mxu1 %vm918_vm0, %v960_v39 }
 0x3d4   : > { %v961_v41 = vadd.f32 %v3911_v35, %v953_v40 }
 0x3d6   : > { %4043 = vmatmul.mubr.msk.f32.vlgmr.msra.gmra.mrb[0].mxu0 %vm918_vm0, %v961_v41  ;;  %4054 = vmatmul.mubr.msk.f32.vlgmr.msra.gmra.mrb[0].mxu1 %vm918_vm0, %v961_v41 }
 0x4a9   : > { %v4044_v44 = vpop.f32.mrb[0].mxu0  ;;  %v4055_v45 = vpop.f32.mrb[0].mxu1 }
 0x4aa   : > { %v1051_v46 = vadd.f32 %v4044_v44, %v3912_v42  ;;  %v1137_v47 = vadd.f32 %v4055_v45, %v3915_v43  ;;  %v1045_v48 = vpop.f32.mrb[1].mxu0  ;;  %v1131_v49 = vpop.f32.mrb[1].mxu1 }
 0x4ab   : > { %v1046_v50 = vadd.f32 %v3912_v42, %v1045_v48  ;;  %v1132_v51 = vadd.f32 %v3915_v43, %v1131_v49 }
 0x4ac   : > { %1141 = vst.msk [vmem:[#allocation2 + $0x8] sm:$0xff] %vm918_vm0, %v1051_v46  ;;  %1143 = vst.msk [vmem:[#allocation3 + $0x8] sm:$0xff] %vm918_vm0, %v1137_v47 }
 0x4ad   : > { %1140 = vst.msk [vmem:[#allocation2] sm:$0xff] %vm918_vm0, %v1046_v50  ;;  %1142 = vst.msk [vmem:[#allocation3] sm:$0xff] %vm918_vm0, %v1132_v51 }
 0x4ae PF: > { %v6340_v52 = vld [vmem:[%s6276_s16] sm:$0xff]  ;;  %vm1147_vm1 = vcmask 261120   ;;  %v1176_v59 = vld [vmem:[#allocation13] sm:$0xff]  ;;  %v5563_v62 = vmov 0.0|0.0   ;;  %vm5564_vm2 = vmmov 0   ;;  %v5565_v1 = vmov 0.0  }
 0x4af   : > { %v1148_v53 = vsel %vm1147_vm1, %v6340_v52, 0.0  ;;  %v1177_v60 = vld [vmem:[#allocation13 + $0x8] sm:$0xff]  ;;  %v1178_v61 = vld [vmem:[#allocation13 + $0x10] sm:$0xff]  ;;  %4226 = vmatprep.subr.bf16.mxu0 %v5563_v62  ;;  %v1179_v0 = vld [vmem:[#allocation13 + $0x18] sm:$0xff]  ;;  %4064 = vmatprep.mubr.msk.f32.mxu0 %vm5564_vm2, %v5565_v1  ;;  %s5566_s18 = smov 104   ;;  %s5567_s13 = smov 120  }
 0x4b0   : > { %1149 = vadd.xlane.f32.xlu0 %v1148_v53  ;;  %v4227_v63 = vpack.c.bf16 %v1177_v60, %v1176_v59  ;;  %v4230_v2 = vpack.c.bf16 %v1179_v0, %v1178_v61  ;;  %v3918_v7 = vld [vmem:[#allocation10] ss:$0 sm:$0xff]  ;;  %v3919_v9 = vld [vmem:[#allocation12] ss:$0 sm:$0xff]  ;;  %v3920_v12 = vld [vmem:[#allocation15] ss:$0 sm:$0xff] }
 0x4b1   : > { %s5568_s24 = smov 112   ;;  %v6362_v19 = vmov 0.0   ;;  %v6364_v20 = vmov 0.0   ;;  %v6366_v21 = vmov 0.0   ;;  %v6368_v22 = vmov 0.0   ;;  %s6386_s1 = smov 0  }
 0x4b2   : > { %4228 = vmatpush3.bf16.msra.mxu0 %v4227_v63  ;;  %v6370_v23 = vmov 0.0   ;;  %v6372_v24 = vmov 0.0   ;;  %v6374_v25 = vmov 0.0   ;;  %v6376_v26 = vmov 0.0  }
 0x4b3   : > { %4229 = vmatprep.subr.bf16.mxu0 %v5563_v62  ;;  %v6378_v27 = vmov -inf   ;;  %v6380_v28 = vmov -inf   ;;  %v6382_v29 = vmov -inf   ;;  %v6384_v30 = vmov -inf  }
 0x4b6   : > { %4231 = vmatpush3.bf16.msra.mxu0 %v4230_v2 }
 0x53d   : > { %v1150_v54 = vpop.xlane.xlu0 %1149 }
 0x53e   : > { %v1152_v55 = vmul.f32 0.03125, %v1150_v54 }
 0x540   : > { %v1153_v56 = vsub.f32 %v6340_v52, %v1152_v55 }
 0x542   : > { %v1154_v57 = vmul.f32 %v1153_v56, %v1153_v56 }
 0x544   : > { %v1155_v58 = vsel %vm1147_vm1, %v1154_v57, 0.0 }
 0x545   : > { %1156 = vadd.xlane.f32.xlu0 %v1155_v58 }
 0x5d2   : > { %v1157_v3 = vpop.xlane.xlu0 %1156 }
 0x5d3   : > { %v1158_v4 = vmul.f32 0.03125, %v1157_v3 }
 0x5d5   : > { %v1159_v5 = vadd.f32 1e-06, %v1158_v4 }
 0x5d7   : > { %4701 = vrsqrt.f32 %v1159_v5 }
 0x5e1   : > { %v4702_v6 = vpop.eup %4701 }
 0x5e2   : > { %v1161_v8 = vmul.f32 %v4702_v6, %v1153_v56 }
 0x5e4   : > { %v1168_v10 = vmul.f32 %v3918_v7, %v1161_v8 }
 0x5e6   : > { %v1175_v11 = vadd.f32 %v3919_v9, %v1168_v10 }
 0x5e8   : > { %4065 = vmatmul.mubr.msk.f32.vlgmr.msra.gmra.mrb[0].mxu0 %vm1147_vm1, %v1175_v11 }
 0x6bb   : > { %v1256_v13 = vpop.f32.mrb[0].mxu0 }
 0x6bc   : > { %v6351_v14 = vadd.f32 %v3920_v12, %v1256_v13  ;;  %v4066_v15 = vpop.f32.mrb[1].mxu0 }
 0x6be   : > { %1265 = vrot.lane.b32.xlu0 %v6351_v14, %s5566_s18  ;;  %1261 = vrot.lane.b32.xlu1 %v6351_v14, %s5567_s13 }
 0x6c2   : > { %1263 = vrot.lane.b32.xlu1 %v6351_v14, %s5568_s24 }
 0x730   : > { %v6356_v16 = vpop.permute.xlu0 %1265  ;;  %v6358_v17 = vpop.permute.xlu1 %1261 }
 0x734   : > { %v6360_v18 = vpop.permute.xlu1 %1263 }
 0x735 LB: >> { %s3922_s3 = sshll.u32 %s5537_s1, 3  ;;  %v5569_v32 = vmov 0.0   ;;  %s5570_s8 = smov 104   ;;  %v5573_v33 = vmov 1983009808   ;;  %v1303_v35 = vlaneseq  ;;  %vm5575_vm3 = vmmov 0   ;;  %s5537_s1 = sphi %s6386_s1, %s1272_s1   ;;  %v5533_v30 = vphi %v6384_v30, %v6931_v30   ;;  %v5529_v29 = vphi %v6382_v29, %v6930_v29   ;;  %v5525_v28 = vphi %v6380_v28, %v6929_v28   ;;  %v5521_v27 = vphi %v6378_v27, %v6928_v27   ;;  %v5517_v26 = vphi %v6376_v26, %v6927_v26   ;;  %v5513_v25 = vphi %v6374_v25, %v6926_v25   ;;  %v5509_v24 = vphi %v6372_v24, %v6925_v24   ;;  %v5505_v23 = vphi %v6370_v23, %v6924_v23   ;;  %v5501_v22 = vphi %v6368_v22, %v6923_v22   ;;  %v5497_v21 = vphi %v6366_v21, %v6922_v21   ;;  %v5493_v20 = vphi %v6364_v20, %v6921_v20   ;;  %v5489_v19 = vphi %v6362_v19, %v6920_v19  }
 0x736   : >> { %s1286_s26 = scalar_lea.vmem [#allocation2], %s3922_s3  ;;  %4067 = vmatprep.subr.mxu0 %v5569_v32  ;;  %4072 = vmatprep.subr.mxu1 %v5569_v32  ;;  %s5571_s23 = smov 120   ;;  %v1301_v34 = vunpack.c.l.s4 %v5573_v33  ;;  %v5574_v38 = vmov 1934713408   ;;  %vm2170_vm4 = vcmask 64512  }
 0x737   : >> { %v1287_v31 = vld [vmem:[%s1286_s26] sm:$0xff]  ;;  %s5572_s12 = smov 112   ;;  %v1304_v37 = vshrl.u32 %v1303_v35, 7  ;;  %v1333_v39 = vunpack.c.l.s4 %v5574_v38  ;;  %4069 = vmatprep.mubr.msk.f32.mxu0 %vm5575_vm3, %v5569_v32  ;;  %4074 = vmatprep.mubr.msk.f32.mxu1 %vm5575_vm3, %v5569_v32  ;;  %s1446_s16 = scalar_lea.vmem [#allocation9], %s5537_s1 }
 0x738   : >> { %1295 = vrot.lane.b32.xlu1 %v1287_v31, %s5570_s8  ;;  %1289 = vrot.lane.b32.xlu0 %v1287_v31, %s5571_s23  ;;  %v1302_v36 = vunpack.c.0.s8 %v1301_v34  ;;  %s1366_s11 = scalar_lea.vmem [#allocation3], %s3922_s3  ;;  %s1272_s1 = sadd.s32 1, %s5537_s1  }
 0x739   : >> { %v1334_v44 = vunpack.c.0.s8 %v1333_v39  ;;  %p6588_p10 = scmp.ge.s32.totalorder %s1272_s1, 2  }
 0x73a   : >> { %v6435_v42 = vsub.s32 %v1302_v36, %v1304_v37  ;;  %s5576_s6 = smov (%p6588_p10), 8   ;;  %s5577_s2 = smov (%p6588_p10), 24   ;;  %vm3045_vm5 = vcmask (%p6588_p10), 130048   ;;  %vm3047_vm6 = vcmask (%p6588_p10), 195584  }
 0x73b   : >> { %v6440_v53 = vsub.s32 %v1334_v44, %v1304_v37  ;;  %s5578_s28 = smov (%p6588_p10), 16   ;;  %s6932_s0 = sld [smem:[#allocation53_spill]] (%p6588_p10) }
 0x73c   : >> { %1292 = vrot.lane.b32.xlu0 %v1287_v31, %s5572_s12  ;;  %s6933_s27 = sld [smem:[#allocation52_spill]] (%p6588_p10)  ;;  %s3544_s13 = sshll.u32 (%p6588_p10), %s6324_s5, 4  ;;  %s6692_s13 = int_to_ptr.vmem [resolvable:$true] %s3544_s13 }
 0x73d   : > { %s6934_s3 = sld [smem:[#allocation78_spill]] (%p6588_p10)  ;;  %p6936_p11 = scmp.ne.s32.totalorder (%p6588_p10), %s6886_s22, 0 }
 0x741   : > { %s3946_s14 = sshll.u32 (%p6588_p10), %s6932_s0, 1 }
 0x742   : > { %s3540_s19 = sadd.s32 (%p6588_p10), %s6933_s27, %s3946_s14 }
 0x743   : > { %s3947_s18 = sshll.u32 (%p6588_p10), %s3540_s19, 7  ;;  %s6935_s26 = smov (%p6588_p10), %s6934_s3 }
 0x7aa   : >> { %v1296_v40 = vpop.permute.xlu1 %1295  ;;  %v1290_v41 = vpop.permute.xlu0 %1289 }
 0x7ab   : >> { %v1314_v43 = vcombine.low %v1290_v41, %v1296_v40  ;;  %v1315_v46 = vcombine.high %v1290_v41, %v1296_v40 }
 0x7ad   : >> { %v1322_v49 = vrot.slane %v1314_v43, %v6435_v42  ;;  %v1329_v54 = vrot.slane %v1315_v46, %v6435_v42 }
 0x7ae   : >> { %v1293_v45 = vpop.permute.xlu0 %1292 }
 0x7af   : >> { %v1298_v47 = vcombine.low %v1287_v31, %v1293_v45  ;;  %v1299_v48 = vcombine.high %v1287_v31, %v1293_v45 }
 0x7b1   : >> { %v1306_v50 = vrot.slane %v1298_v47, %v6435_v42  ;;  %v1313_v51 = vrot.slane %v1299_v48, %v6435_v42 }
 0x7b3   : >> { %v1331_v55 = vcombine.high %v1306_v50, %v1322_v49  ;;  %v1330_v56 = vcombine.low %v1306_v50, %v1322_v49  ;;  %v1346_v59 = vcombine.low %v1313_v51, %v1329_v54  ;;  %v1347_v63 = vcombine.high %v1313_v51, %v1329_v54 }
 0x7b5   : >> { %v1345_v57 = vrot.slane %v1331_v55, %v6440_v53  ;;  %v1338_v58 = vrot.slane %v1330_v56, %v6440_v53  ;;  %v1354_v60 = vrot.slane %v1346_v59, %v6440_v53  ;;  %v1361_v0 = vrot.slane %v1347_v63, %v6440_v53 }
 0x7b7   : >> { %1518 = vxpose.xlu0.b32.start.end [1/1] (short) (narrow) %v1345_v57, 8  ;;  %1454 = vxpose.xlu1.b32.start.end [1/1] (short) (narrow) %v1338_v58, 8  ;;  %v1362_v61 = vcombine.high %v1338_v58, %v5569_v32  ;;  %v1363_v2 = vcombine.high %v1345_v57, %v5569_v32  ;;  %v1364_v3 = vcombine.high %v1354_v60, %v5569_v32 }
 0x7b8   : >> { %v1365_v4 = vcombine.high %v1361_v0, %v5569_v32 }
 0x7bb   : >> { %1582 = vxpose.xlu1.b32.start.end [1/1] (short) (narrow) %v1354_v60, 8  ;;  %1486 = vxpose.xlu0.b32.start.end [1/1] (short) (narrow) %v1362_v61, 8 }
 0x7bf   : >> { %1646 = vxpose.xlu1.b32.start.end [1/1] (short) (narrow) %v1361_v0, 8  ;;  %1550 = vxpose.xlu0.b32.start.end [1/1] (short) (narrow) %v1363_v2, 8 }
 0x7c3   : >> { %1614 = vxpose.xlu0.b32.start.end [1/1] (short) (narrow) %v1364_v3, 8 }
 0x7c7   : >> { %1678 = vxpose.xlu0.b32.start.end [1/1] (short) (narrow) %v1365_v4, 8 }
 0x837   : >> { %v1534_v5 = vpop.trf.xlu0  ;;  %v1470_v6 = vpop.trf.xlu1 }
 0x838   : >> { %v1710_v13 = vcombine.low %v1470_v6, %v1534_v5  ;;  %v1711_v43 = vcombine.high %v1470_v6, %v1534_v5 }
 0x83a   : >> { %v1718_v34 = vrot.slane %v1710_v13, %v6435_v42  ;;  %v1725_v54 = vrot.slane %v1711_v43, %v6435_v42 }
 0x83b   : >> { %v1502_v7 = vpop.trf.xlu0  ;;  %v1598_v8 = vpop.trf.xlu1 }
 0x83f   : >> { %v1566_v9 = vpop.trf.xlu0  ;;  %v1662_v11 = vpop.trf.xlu1 }
 0x840   : >> { %v1726_v10 = vcombine.low %v1502_v7, %v1566_v9  ;;  %v1742_v31 = vcombine.low %v1598_v8, %v1662_v11  ;;  %v1727_v37 = vcombine.high %v1502_v7, %v1566_v9  ;;  %v1743_v38 = vcombine.high %v1598_v8, %v1662_v11 }
 0x842   : >> { %v1734_v15 = vrot.slane %v1726_v10, %v6435_v42  ;;  %v1750_v39 = vrot.slane %v1742_v31, %v6435_v42  ;;  %v1741_v47 = vrot.slane %v1727_v37, %v6435_v42  ;;  %v1757_v48 = vrot.slane %v1743_v38, %v6435_v42 }
 0x843   : >> { %v1630_v12 = vpop.trf.xlu0 }
 0x844   : >> { %v1774_v41 = vcombine.low %v1718_v34, %v1734_v15  ;;  %v1775_v51 = vcombine.high %v1718_v34, %v1734_v15  ;;  %v1790_v60 = vcombine.low %v1725_v54, %v1741_v47  ;;  %v1791_v4 = vcombine.high %v1725_v54, %v1741_v47 }
 0x846   : >> { %v1782_v49 = vrot.slane %v1774_v41, %v6440_v53  ;;  %v1789_v59 = vrot.slane %v1775_v51, %v6440_v53  ;;  %v1798_v3 = vrot.slane %v1790_v60, %v6440_v53  ;;  %v1805_v8 = vrot.slane %v1791_v4, %v6440_v53 }
 0x847   : >> { %v1694_v33 = vpop.trf.xlu0 }
 0x848   : >> { %v1758_v35 = vcombine.low %v1630_v12, %v1694_v33  ;;  %v1759_v36 = vcombine.high %v1630_v12, %v1694_v33 }
 0x84a   : >> { %v1766_v40 = vrot.slane %v1758_v35, %v6435_v42  ;;  %v1773_v44 = vrot.slane %v1759_v36, %v6435_v42 }
 0x84c   : >> { %v1806_v45 = vcombine.low %v1750_v39, %v1766_v40  ;;  %v1807_v46 = vcombine.high %v1750_v39, %v1766_v40  ;;  %v1822_v58 = vcombine.low %v1757_v48, %v1773_v44  ;;  %v1823_v2 = vcombine.high %v1757_v48, %v1773_v44 }
 0x84e   : >> { %v1814_v50 = vrot.slane %v1806_v45, %v6440_v53  ;;  %v1821_v57 = vrot.slane %v1807_v46, %v6440_v53  ;;  %v1830_v0 = vrot.slane %v1822_v58, %v6440_v53  ;;  %v1837_v7 = vrot.slane %v1823_v2, %v6440_v53 }
 0x850   : >> { %v1839_v55 = vcombine.high %v1782_v49, %v1814_v50  ;;  %v1838_v56 = vcombine.low %v1782_v49, %v1814_v50  ;;  %v1841_v61 = vcombine.high %v1789_v59, %v1821_v57  ;;  %v1840_v63 = vcombine.low %v1789_v59, %v1821_v57  ;;  %v3923_v59 = vld [vmem:[%s1446_s16] ss:$0 sm:$0xff]  ;;  %s5579_s16 = smov (%p6588_p10), [#allocation34]  }
 0x851   : >> { %v1843_v5 = vcombine.high %v1798_v3, %v1830_v0  ;;  %v1842_v6 = vcombine.low %v1798_v3, %v1830_v0  ;;  %v1845_v9 = vcombine.high %v1805_v8, %v1837_v7  ;;  %v1844_v10 = vcombine.low %v1805_v8, %v1837_v7 }
 0x852   : >> { %1878 = vxpose.xlu0.b32.start.end [1/1] (short) (narrow) %v1839_v55, 8  ;;  %1846 = vxpose.xlu1.b32.start.end [1/1] (short) (narrow) %v1838_v56, 8 }
 0x856   : >> { %1942 = vxpose.xlu0.b32.start.end [1/1] (short) (narrow) %v1841_v61, 8  ;;  %1910 = vxpose.xlu1.b32.start.end [1/1] (short) (narrow) %v1840_v63, 8 }
 0x85a   : >> { %2006 = vxpose.xlu0.b32.start.end [1/1] (short) (narrow) %v1843_v5, 8  ;;  %1974 = vxpose.xlu1.b32.start.end [1/1] (short) (narrow) %v1842_v6, 8 }
 0x85e   : >> { %2070 = vxpose.xlu0.b32.start.end [1/1] (short) (narrow) %v1845_v9, 8  ;;  %2038 = vxpose.xlu1.b32.start.end [1/1] (short) (narrow) %v1844_v10, 8  ;;  %v1367_v10 = vld [vmem:[%s1366_s11] sm:$0xff]  ;;  %s5275_s11 = sshll.u32 (%p6588_p10), %s5579_s16, 4  ;;  %s5276_s11 = int_to_ptr.vmem [resolvable:$false] %s5275_s11 }
 0x85f   : > { %s5277_s21 = scalar_lea.vmem (%p6588_p10), %s5276_s11, 256  ;;  %p5278_p4 = scmp.lt.s32.totalorder (%p6588_p10), %s6692_s13, %s5276_s11 }
 0x8d2   : >> { %v1894_v11 = vpop.trf.xlu0  ;;  %v1862_v12 = vpop.trf.xlu1 }
 0x8d6   : >> { %v1958_v13 = vpop.trf.xlu0  ;;  %v1926_v15 = vpop.trf.xlu1 }
 0x8d7   : >> { %v2110_v31 = vcombine.low %v1894_v11, %v1958_v13  ;;  %v2102_v33 = vcombine.low %v1862_v12, %v1926_v15 }
 0x8d9   : >> { %v2117_v36 = vrot.slane %v2110_v31, %v6435_v42  ;;  %v2109_v37 = vrot.slane %v2102_v33, %v6435_v42 }
 0x8da   : >> { %v2022_v34 = vpop.trf.xlu0  ;;  %v1990_v35 = vpop.trf.xlu1 }
 0x8db   : >> { %v2134_v43 = vcombine.low %v2109_v37, %v2117_v36  ;;  %v2135_v48 = vcombine.high %v2109_v37, %v2117_v36 }
 0x8dd   : >> { %v2142_v49 = vrot.slane %v2134_v43, %v6440_v53  ;;  %v2149_v56 = vrot.slane %v2135_v48, %v6440_v53 }
 0x8de   : >> { %v2086_v38 = vpop.trf.xlu0  ;;  %v2054_v39 = vpop.trf.xlu1 }
 0x8df   : >> { %v2126_v40 = vcombine.low %v2022_v34, %v2086_v38  ;;  %v2118_v41 = vcombine.low %v1990_v35, %v2054_v39 }
 0x8e1   : >> { %v2133_v44 = vrot.slane %v2126_v40, %v6435_v42  ;;  %v2125_v45 = vrot.slane %v2118_v41, %v6435_v42 }
 0x8e3   : >> { %v2150_v46 = vcombine.low %v2125_v45, %v2133_v44  ;;  %v2151_v47 = vcombine.high %v2125_v45, %v2133_v44 }
 0x8e5   : >> { %v2158_v50 = vrot.slane %v2150_v46, %v6440_v53  ;;  %v2165_v51 = vrot.slane %v2151_v47, %v6440_v53 }
 0x8e7   : >> { %v2166_v54 = vcombine.low %v2142_v49, %v2158_v50  ;;  %v2167_v55 = vcombine.high %v2142_v49, %v2158_v50  ;;  %v2168_v57 = vcombine.low %v2149_v56, %v2165_v51  ;;  %v2169_v58 = vcombine.high %v2149_v56, %v2165_v51 }
 0x8e9   : >> { %4068 = vmatpush3.msra.mxu0 %v2166_v54  ;;  %4073 = vmatpush3.msra.mxu1 %v2167_v55 }
 0x8ea   : >> { %4070 = vmatmul.mubr.msk.f32.vlgmr.msra.gmra.mrb[0].mxu0 %vm2170_vm4, %v6351_v14  ;;  %4075 = vmatmul.mubr.msk.f32.vlgmr.msra.gmra.mrb[0].mxu1 %vm2170_vm4, %v6358_v17 }
 0x8eb   : >> { %4077 = vmatprep.subr.mxu0 %v5569_v32  ;;  %4082 = vmatprep.subr.mxu1 %v5569_v32 }
 0x8ec   : >> { %4078 = vmatpush3.msra.mxu0 %v2168_v57  ;;  %4083 = vmatpush3.msra.mxu1 %v2169_v58 }
 0x8ed   : >> { %4079 = vmatprep.mubr.msk.f32.mxu0 %vm5575_vm3, %v5569_v32  ;;  %4084 = vmatprep.mubr.msk.f32.mxu1 %vm5575_vm3, %v5569_v32 }
 0x8ee   : >> { %4080 = vmatmul.mubr.msk.f32.vlgmr.msra.gmra.mrb[2].mxu0 %vm2170_vm4, %v6360_v18  ;;  %4085 = vmatmul.mubr.msk.f32.vlgmr.msra.gmra.mrb[2].mxu1 %vm2170_vm4, %v6356_v16 }
 0x8ef   : >> { %4087 = vmatprep.subr.mxu0 %v5569_v32  ;;  %4092 = vmatprep.subr.mxu1 %v5569_v32 }
 0x8f0   : >> { %4089 = vmatprep.mubr.msk.f32.mxu0 %vm5575_vm3, %v5569_v32  ;;  %4094 = vmatprep.mubr.msk.f32.mxu1 %vm5575_vm3, %v5569_v32 }
 0x9bd   : >> { %v2239_v60 = vpop.f32.mrb[0].mxu0  ;;  %v2311_v61 = vpop.f32.mrb[0].mxu1 }
 0x9be   : >> { %v2240_v63 = vadd.f32 %v3923_v59, %v2239_v60  ;;  %v2312_v0 = vadd.f32 %v3923_v59, %v2311_v61  ;;  %v4071_v2 = vpop.f32.mrb[1].mxu0  ;;  %v4076_v3 = vpop.f32.mrb[1].mxu1 }
 0x9c0   : >> { %v2462_v4 = vsel %vm2170_vm4, %v2312_v0, -inf  ;;  %v2459_v5 = vsel %vm2170_vm4, %v2240_v63, -inf }
 0x9c1   : >> { %2463 = vmax.xlane.f32.xlu0 %v2462_v4  ;;  %2460 = vmax.xlane.f32.xlu1 %v2459_v5  ;;  %v2383_v6 = vpop.f32.mrb[2].mxu0  ;;  %v2455_v7 = vpop.f32.mrb[2].mxu1 }
 0x9c2   : >> { %v4081_v8 = vpop.f32.mrb[3].mxu0  ;;  %v4086_v9 = vpop.f32.mrb[3].mxu1  ;;  %v2384_v11 = vadd.f32 %v3923_v59, %v2383_v6  ;;  %v2456_v12 = vadd.f32 %v3923_v59, %v2455_v7 }
 0x9c4   : >> { %v2465_v13 = vsel %vm2170_vm4, %v2384_v11, -inf  ;;  %v2468_v15 = vsel %vm2170_vm4, %v2456_v12, -inf }
 0x9d2   : >> { %1372 = vrot.lane.b32.xlu1 %v1367_v10, %s5572_s12  ;;  %s5271_s12 = scalar_lea.vmem (%p6588_p10), %s6692_s13, 128 }
 0x9d3   : > { %p5272_p9 = scmp.ne.s32.totalorder (%p6588_p10), %s6692_s13, %s5271_s12  ;;  %p5279_p3 = scmp.lt.s32.totalorder (%p6588_p10), %s5277_s21, %s5271_s12 }
 0x9d5   : > { %p5273_p0 = pnand (%p6588_p10), %p5272_p9, %p6936_p11  ;;  %p5280_p6 = por (%p6588_p10), %p5279_p3, %p5278_p4 }
 0x9d7   : >> { %1369 = vrot.lane.b32.xlu0 %v1367_v10, %s5571_s23  ;;  %s3529_s23 = scalar_lea.sflag (%p6588_p10), [#allocation6], %s6272_s30  ;;  %p5274_p2 = pneg (%p6588_p10), %p5273_p0 }
 0x9d9   : > { %p5281_p13 = pnand (%p6588_p10), %p5280_p6, %p5274_p2 }
 0x9f6   : >> { %2466 = vmax.xlane.f32.xlu1 %v2465_v13 }
 0x9fa   : >> { %2469 = vmax.xlane.f32.xlu1 %v2468_v15 }
 0xa0b   : >> { %1375 = vrot.lane.b32.xlu1 %v1367_v10, %s5570_s8  ;;  %s6690_s8 = scalar_lea.hbm (%p6588_p10), %s6934_s3, %s3947_s18 }
 0xa4e   : >> { %v2464_v31 = vpop.xlane.xlu0 %2463  ;;  %v2461_v33 = vpop.xlane.xlu1 %2460 }
 0xa4f   : >> { %v6510_v34 = vmax.f32 %v5529_v29, %v2464_v31   ;;  %v6513_v35 = vmax.f32 %v5533_v30, %v2461_v33  }
 0xa51   : >> { %v2476_v36 = vsub.f32 %v5529_v29, %v6510_v34  ;;  %v2488_v37 = vsub.f32 %v2312_v0, %v6510_v34  ;;  %v2475_v38 = vsub.f32 %v5533_v30, %v6513_v35  ;;  %v2487_v39 = vsub.f32 %v2240_v63, %v6513_v35 }
 0xa52   : >> { %v1373_v47 = vpop.permute.xlu1 %1372  ;;  %v1370_v57 = vpop.permute.xlu0 %1369 }
 0xa53   : >> { %v2493_v40 = vmul.f32 1.442695, %v2488_v37  ;;  %v2491_v41 = vmul.f32 1.442695, %v2487_v39  ;;  %v1378_v58 = vcombine.low %v1367_v10, %v1373_v47  ;;  %v1379_v59 = vcombine.high %v1367_v10, %v1373_v47 }
 0xa55   : >> { %4703 = vpow2.f32 %v2493_v40  ;;  %v1386_v4 = vrot.slane %v1378_v58, %v6435_v42  ;;  %v1393_v5 = vrot.slane %v1379_v59, %v6435_v42 }
 0xa56   : >> { %4705 = vpow2.f32 %v2491_v41 }
 0xa5f   : >> { %v6521_v43 = vpop.eup %4703 }
 0xa60   : >> { %v2506_v44 = vsel %vm2170_vm4, %v6521_v43, 0.0  ;;  %v4706_v45 = vpop.eup %4705 }
 0xa61   : >> { %2507 = vadd.xlane.f32.xlu1 %v2506_v44  ;;  %v2503_v46 = vsel %vm2170_vm4, %v4706_v45, 0.0 }
 0xa62   : >> { %2504 = vadd.xlane.f32.xlu0 %v2503_v46 }
 0xa83   : >> { %v2467_v48 = vpop.xlane.xlu1 %2466 }
 0xa84   : >> { %v6527_v49 = vmax.f32 %v5525_v28, %v2467_v48  }
 0xa86   : >> { %v2477_v50 = vsub.f32 %v5525_v28, %v6527_v49  ;;  %v2489_v51 = vsub.f32 %v2384_v11, %v6527_v49 }
 0xa87   : >> { %v2470_v54 = vpop.xlane.xlu1 %2469 }
 0xa88   : >> { %v2495_v55 = vmul.f32 1.442695, %v2489_v51  ;;  %v6533_v56 = vmax.f32 %v5521_v27, %v2470_v54   ;;  %v2483_v29 = vmul.f32 1.442695, %v2477_v50 }
 0xa8a   : >> { %v2478_v60 = vsub.f32 %v5521_v27, %v6533_v56  ;;  %v2490_v61 = vsub.f32 %v2456_v12, %v6533_v56  ;;  %4707 = vpow2.f32 %v2495_v55 }
 0xa8b   : >> { %v1376_v63 = vpop.permute.xlu1 %1375 }
 0xa8c   : >> { %v2497_v0 = vmul.f32 1.442695, %v2490_v61  ;;  %v1394_v2 = vcombine.low %v1370_v57, %v1376_v63  ;;  %v1395_v3 = vcombine.high %v1370_v57, %v1376_v63  ;;  %v2485_v30 = vmul.f32 1.442695, %v2478_v60 }
 0xa8e   : >> { %v1402_v6 = vrot.slane %v1394_v2, %v6435_v42  ;;  %v1409_v7 = vrot.slane %v1395_v3, %v6435_v42  ;;  %4709 = vpow2.f32 %v2497_v0 }
 0xa90   : >> { %v1410_v8 = vcombine.low %v1386_v4, %v1402_v6  ;;  %v1411_v9 = vcombine.high %v1386_v4, %v1402_v6  ;;  %v1426_v10 = vcombine.low %v1393_v5, %v1409_v7  ;;  %v1427_v11 = vcombine.high %v1393_v5, %v1409_v7 }
 0xa92   : >> { %v1418_v12 = vrot.slane %v1410_v8, %v6440_v53  ;;  %v1425_v13 = vrot.slane %v1411_v9, %v6440_v53  ;;  %v1434_v15 = vrot.slane %v1426_v10, %v6440_v53  ;;  %v1441_v31 = vrot.slane %v1427_v11, %v6440_v53 }
 0xa94   : >> { %v2523_v33 = vcombine.low %v1418_v12, %v1425_v13  ;;  %v3928_v37 = vcombine.high %v1418_v12, %v1425_v13  ;;  %v2539_v39 = vcombine.low %v1434_v15, %v1441_v31  ;;  %v3929_v40 = vcombine.high %v1434_v15, %v1441_v31  ;;  %v4708_v41 = vpop.eup %4707 }
 0xa95   : >> { %v2509_v51 = vsel %vm2170_vm4, %v4708_v41, 0.0 }
 0xa96   : >> { %v2530_v44 = vrot.slane %v2523_v33, %v6435_v42  ;;  %v2538_v46 = vrot.slane %v3928_v37, %v6435_v42  ;;  %v2546_v47 = vrot.slane %v2539_v39, %v6435_v42  ;;  %v2554_v48 = vrot.slane %v3929_v40, %v6435_v42  ;;  %2510 = vadd.xlane.f32.xlu0 %v2509_v51 }
 0xa98   : >> { %v2555_v54 = vcombine.low %v2530_v44, %v2538_v46  ;;  %v2571_v55 = vcombine.low %v2546_v47, %v2554_v48  ;;  %v2556_v57 = vcombine.high %v2530_v44, %v2538_v46  ;;  %v2572_v58 = vcombine.high %v2546_v47, %v2554_v48  ;;  %v4710_v59 = vpop.eup %4709 }
 0xa99   : >> { %v2512_v61 = vsel %vm2170_vm4, %v4710_v59, 0.0 }
 0xa9a   : >> { %v2563_v63 = vrot.slane %v2555_v54, %v6440_v53  ;;  %v2579_v0 = vrot.slane %v2571_v55, %v6440_v53  ;;  %v2570_v2 = vrot.slane %v2556_v57, %v6440_v53  ;;  %v2586_v3 = vrot.slane %v2572_v58, %v6440_v53  ;;  %2513 = vadd.xlane.f32.xlu0 %v2512_v61  ;;  %v3049_v58 = vld [vmem:[#allocation22] sm:$0xff] (%p6588_p10) }
 0xa9c   : >> { %v2587_v4 = vcombine.low %v2563_v63, %v2579_v0  ;;  %v2588_v5 = vcombine.high %v2563_v63, %v2579_v0  ;;  %v2589_v6 = vcombine.low %v2570_v2, %v2586_v3  ;;  %v2590_v7 = vcombine.high %v2570_v2, %v2586_v3 }
 0xa9e   : >> { %4088 = vmatpush3.msra.mxu0 %v2587_v4  ;;  %4093 = vmatpush3.msra.mxu1 %v2588_v5 }
 0xa9f   : >> { %4090 = vmatmul.mubr.msk.f32.vlgmr.msra.gmra.mrb[4].mxu0 %vm2170_vm4, %v4706_v45  ;;  %4095 = vmatmul.mubr.msk.f32.vlgmr.msra.gmra.mrb[4].mxu1 %vm2170_vm4, %v6521_v43  ;;  %v2481_v43 = vmul.f32 1.442695, %v2476_v36  ;;  %v2479_v45 = vmul.f32 1.442695, %v2475_v38 }
 0xaa0   : >> { %4097 = vmatprep.subr.mxu0 %v5569_v32  ;;  %4102 = vmatprep.subr.mxu1 %v5569_v32 }
 0xaa1   : >> { %4098 = vmatpush3.msra.mxu0 %v2589_v6  ;;  %4103 = vmatpush3.msra.mxu1 %v2590_v7  ;;  %4711 = vpow2.f32 %v2481_v43  ;;  %v3051_v43 = vld [vmem:[#allocation22 + $0x10] sm:$0xff] (%p6588_p10) }
 0xaa2   : >> { %4099 = vmatprep.mubr.msk.f32.mxu0 %vm5575_vm3, %v5569_v32  ;;  %4104 = vmatprep.mubr.msk.f32.mxu1 %vm5575_vm3, %v5569_v32  ;;  %4713 = vpow2.f32 %v2479_v45  ;;  %v3052_v45 = vld [vmem:[#allocation22 + $0x18] sm:$0xff] (%p6588_p10) }
 0xaa3   : >> { %4100 = vmatmul.mubr.msk.f32.vlgmr.msra.gmra.mrb[6].mxu0 %vm2170_vm4, %v4708_v41  ;;  %4105 = vmatmul.mubr.msk.f32.vlgmr.msra.gmra.mrb[6].mxu1 %vm2170_vm4, %v4710_v59  ;;  %4715 = vpow2.f32 %v2483_v29  ;;  %v6930_v29 = vmov %v6510_v34  ;;  %v3050_v59 = vld [vmem:[#allocation22 + $0x8] sm:$0xff] (%p6588_p10) }
 0xaa4   : >> { %4717 = vpow2.f32 %v2485_v30  ;;  %v6931_v30 = vmov %v6513_v35  ;;  %4232 = vmatprep.subr.bf16.mxu0 (%p6588_p10), %v5563_v62  ;;  %4115 = vmatprep.mubr.msk.f32.mxu0 (%p6588_p10), %vm5564_vm2, %v5565_v1 }
 0xaa5   : > { %4238 = vmatprep.subr.bf16.mxu1 (%p6588_p10), %v5563_v62  ;;  %4126 = vmatprep.mubr.msk.f32.mxu1 (%p6588_p10), %vm5564_vm2, %v5565_v1 }
 0xaab   : >> { %v4712_v8 = vpop.eup %4711 }
 0xaac   : >> { %v4714_v9 = vpop.eup %4713  ;;  %v2500_v10 = vmul.f32 %v5513_v25, %v4712_v8  ;;  %v2520_v28 = vmul.f32 %v5497_v21, %v4712_v8 }
 0xaad   : >> { %v2499_v32 = vmul.f32 %v5517_v26, %v4714_v9  ;;  %v4716_v36 = vpop.eup %4715  ;;  %v2519_v40 = vmul.f32 %v5501_v22, %v4714_v9 }
 0xaae   : >> { %v2501_v38 = vmul.f32 %v5509_v24, %v4716_v36  ;;  %v4718_v25 = vpop.eup %4717  ;;  %v2521_v47 = vmul.f32 %v5493_v20, %v4716_v36 }
 0xaaf   : >> { %v2502_v26 = vmul.f32 %v5505_v23, %v4718_v25  ;;  %v2522_v24 = vmul.f32 %v5489_v19, %v4718_v25 }
 0xaee   : >> { %v2508_v11 = vpop.xlane.xlu1 %2507 }
 0xaef   : >> { %v2516_v12 = vadd.f32 %v2508_v11, %v2500_v10   ;;  %v2505_v13 = vpop.xlane.xlu0 %2504 }
 0xaf0   : >> { %v2515_v15 = vadd.f32 %v2505_v13, %v2499_v32   ;;  %v4236_v32 = vpack.c.bf16 (%p6588_p10), %v3052_v45, %v3051_v43  ;;  %v3363_v45 = vld [vmem:[#allocation31 + $0x88] sm:$0xff] (%p6588_p10) }
 0xaf1   : >> { %v6926_v25 = vmov %v2516_v12 }
 0xaf2   : > { %4719 = vrcp.f32 (%p6588_p10), %v2515_v15 }
 0xaf3   : > { %4721 = vrcp.f32 (%p6588_p10), %v2516_v12 }
 0xafc   : > { %v4720_v14 = vpop.eup (%p6588_p10), %4719 }
 0xafd   : > { %v4722_v16 = vpop.eup (%p6588_p10), %4721 }
 0xb23   : >> { %v2511_v31 = vpop.xlane.xlu0 %2510 }
 0xb24   : >> { %v2517_v33 = vadd.f32 %v2511_v31, %v2501_v38  }
 0xb26   : > { %4723 = vrcp.f32 (%p6588_p10), %v2517_v33 }
 0xb27   : >> { %v2514_v37 = vpop.xlane.xlu0 %2513 }
 0xb28   : >> { %v2518_v39 = vadd.f32 %v2514_v37, %v2502_v26   ;;  %v6927_v26 = vmov %v2515_v15 }
 0xb2a   : > { %4725 = vrcp.f32 (%p6588_p10), %v2518_v39 }
 0xb30   : > { %v4724_v18 = vpop.eup (%p6588_p10), %4723 }
 0xb72   : >> { %v2660_v50 = vpop.f32.mrb[4].mxu0  ;;  %v2733_v41 = vpop.f32.mrb[4].mxu1 }
 0xb73   : >> { %v2883_v44 = vadd.f32 %v2660_v50, %v2519_v40   ;;  %v2884_v46 = vadd.f32 %v2733_v41, %v2520_v28   ;;  %v4091_v27 = vpop.f32.mrb[5].mxu0  ;;  %v4096_v60 = vpop.f32.mrb[5].mxu1  ;;  %v6929_v28 = vmov %v6527_v49  ;;  %1271 = sbr.rel (!%p6588_p10) target bundleno = 1845 (0x735), region = 237  ;;  %v4233_v49 = vpack.c.bf16 (%p6588_p10), %v3050_v59, %v3049_v58 }
 0xb74   : >> { %v6928_v27 = vmov %v6533_v56 }
 0xb75   : >> { %v6922_v21 = vmov %v2884_v46  ;;  %v6923_v22 = vmov %v2883_v44  ;;  %4234 = vmatpush3.bf16.msra.mxu0 (%p6588_p10), %v4233_v49  ;;  %v2891_v17 = vmul.f32 (%p6588_p10), %v4720_v14, %v2883_v44 }
 0xb76   : >> { %v2806_v48 = vpop.f32.mrb[6].mxu0  ;;  %v2879_v51 = vpop.f32.mrb[6].mxu1  ;;  %4235 = vmatprep.subr.bf16.mxu0 (%p6588_p10), %v5563_v62 }
 0xb77   : >> { %v2885_v54 = vadd.f32 %v2806_v48, %v2521_v47   ;;  %v2886_v55 = vadd.f32 %v2879_v51, %v2522_v24   ;;  %v4101_v23 = vpop.f32.mrb[7].mxu0  ;;  %v4106_v57 = vpop.f32.mrb[7].mxu1  ;;  %v6925_v24 = vmov %v2517_v33 }
 0xb78   : >> { %v6924_v23 = vmov %v2518_v39 }
 0xb79   : >> { %v6920_v19 = vmov %v2886_v55  ;;  %v6921_v20 = vmov %v2885_v54  ;;  %v2893_v21 = vmul.f32 (%p6588_p10), %v4724_v18, %v2885_v54  ;;  %4237 = vmatpush3.bf16.msra.mxu0 (%p6588_p10), %v4236_v32  ;;  %v3163_v18 = vld [vmem:[#allocation28] sm:$0xff] (%p6588_p10) }
 0xb7a   : > { %v2892_v19 = vmul.f32 %v4722_v16, %v2884_v46  ;;  %v4726_v20 = vpop.eup %4725  ;;  %4244 = vmatprep.subr.bf16.mxu0 %v5563_v62 }
 0xb7b   : > { %v2894_v22 = vmul.f32 %v4726_v20, %v2886_v55  ;;  %v2895_v34 = vcombine.low %v2891_v17, %v2893_v21  ;;  %v2896_v35 = vcombine.high %v2891_v17, %v2893_v21  ;;  %v3272_v20 = vld [vmem:[#allocation28 + $0x8] sm:$0xff] }
 0xb7d   : > { %v2911_v56 = vcombine.low %v2892_v19, %v2894_v22  ;;  %v2912_v61 = vcombine.high %v2892_v19, %v2894_v22  ;;  %v2903_v63 = vrot.slane %v2895_v34, %v6435_v42  ;;  %v2910_v0 = vrot.slane %v2896_v35, %v6435_v42  ;;  %v3164_v19 = vld [vmem:[#allocation28 + $0x10] sm:$0xff]  ;;  %v3273_v22 = vld [vmem:[#allocation28 + $0x18] sm:$0xff]  ;;  %v3165_v34 = vld [vmem:[#allocation28 + $0x20] sm:$0xff] }
 0xb7e   : > { %v4239_v21 = vpack.c.bf16 %v3164_v19, %v3163_v18  ;;  %v4245_v35 = vpack.c.bf16 %v3273_v22, %v3272_v20  ;;  %v3376_v19 = vld [vmem:[#allocation31 + $0xf0] sm:$0xff]  ;;  %v3377_v20 = vld [vmem:[#allocation31 + $0xf8] sm:$0xff] }
 0xb7f   : > { %v2919_v2 = vrot.slane %v2911_v56, %v6435_v42  ;;  %v2926_v3 = vrot.slane %v2912_v61, %v6435_v42  ;;  %v3274_v56 = vld [vmem:[#allocation28 + $0x28] sm:$0xff]  ;;  %v3275_v61 = vld [vmem:[#allocation28 + $0x38] sm:$0xff] }
 0xb80   : > { %4240 = vmatpush3.bf16.msra.mxu1 %v4239_v21  ;;  %v3270_v21 = vld [vmem:[#allocation31 + $0x70] sm:$0xff]  ;;  %v3271_v22 = vld [vmem:[#allocation31 + $0x78] sm:$0xff] }
 0xb81   : > { %v2927_v4 = vcombine.low %v2903_v63, %v2919_v2  ;;  %v2928_v5 = vcombine.high %v2903_v63, %v2919_v2  ;;  %v2943_v6 = vcombine.low %v2910_v0, %v2926_v3  ;;  %v2944_v7 = vcombine.high %v2910_v0, %v2926_v3  ;;  %4241 = vmatprep.subr.bf16.mxu1 %v5563_v62 }
 0xb82   : > { %v4248_v0 = vpack.c.bf16 %v3275_v61, %v3274_v56  ;;  %v3942_v56 = vld [vmem:[#allocation30 + $0x1] ss:$0 sm:$0xff] }
 0xb83   : > { %v2935_v8 = vrot.slane %v2927_v4, %v6440_v53  ;;  %v2942_v9 = vrot.slane %v2928_v5, %v6440_v53  ;;  %v2951_v10 = vrot.slane %v2943_v6, %v6440_v53  ;;  %v2958_v11 = vrot.slane %v2944_v7, %v6440_v53  ;;  %v3938_v6 = vld [vmem:[#allocation25] ss:$0 sm:$0xff]  ;;  %v3362_v7 = vld [vmem:[#allocation31 + $0x80] sm:$0xff] }
 0xb84   : > { %v4251_v32 = vpack.c.bf16 %v3363_v45, %v3362_v7 }
 0xb85   : > { %v2963_v12 = vcombine.low %v2935_v8, %v2942_v9  ;;  %v3934_v13 = vcombine.high %v2935_v8, %v2942_v9  ;;  %v2979_v15 = vcombine.low %v2951_v10, %v2958_v11  ;;  %v3935_v29 = vcombine.high %v2951_v10, %v2958_v11  ;;  %v3256_v8 = vld [vmem:[#allocation31] sm:$0xff]  ;;  %v3257_v9 = vld [vmem:[#allocation31 + $0x8] sm:$0xff]  ;;  %v3939_v10 = vld [vmem:[#allocation27] ss:$0 sm:$0xff] }
 0xb87   : > { %v2970_v30 = vrot.slane %v2963_v12, %v6435_v42  ;;  %v2978_v36 = vrot.slane %v3934_v13, %v6435_v42  ;;  %v2986_v38 = vrot.slane %v2979_v15, %v6435_v42  ;;  %v2994_v25 = vrot.slane %v3935_v29, %v6435_v42  ;;  %v3364_v15 = vld [vmem:[#allocation31 + $0x90] sm:$0xff]  ;;  %v3365_v29 = vld [vmem:[#allocation31 + $0x98] sm:$0xff] }
 0xb88   : > { %v4275_v12 = vpack.c.bf16 %v3257_v9, %v3256_v8 }
 0xb89   : > { %v2995_v31 = vcombine.low %v2970_v30, %v2978_v36  ;;  %v3011_v33 = vcombine.low %v2986_v38, %v2994_v25  ;;  %v2996_v26 = vcombine.high %v2970_v30, %v2978_v36  ;;  %v3012_v37 = vcombine.high %v2986_v38, %v2994_v25  ;;  %v3258_v30 = vld [vmem:[#allocation31 + $0x10] sm:$0xff]  ;;  %v3259_v38 = vld [vmem:[#allocation31 + $0x18] sm:$0xff] }
 0xb8a   : > { %v4254_v36 = vpack.c.bf16 %v3365_v29, %v3364_v15  ;;  %v4278_v25 = vpack.c.bf16 %v3259_v38, %v3258_v30 }
 0xb8b   : > { %v3003_v39 = vrot.slane %v2995_v31, %v6440_v53  ;;  %v3019_v40 = vrot.slane %v3011_v33, %v6440_v53  ;;  %v3010_v28 = vrot.slane %v2996_v26, %v6440_v53  ;;  %v3026_v50 = vrot.slane %v3012_v37, %v6440_v53  ;;  %v3936_v53 = vld [vmem:[#allocation24] ss:$0 sm:$0xff]  ;;  %v3366_v31 = vld [vmem:[#allocation31 + $0xa0] sm:$0xff]  ;;  %v3367_v33 = vld [vmem:[#allocation31 + $0xa8] sm:$0xff] }
 0xb8c   : > { %v3260_v26 = vld [vmem:[#allocation31 + $0x20] sm:$0xff]  ;;  %v4257_v37 = vpack.c.bf16 %v3367_v33, %v3366_v31 }
 0xb8d   : > { %v3028_v41 = vcombine.high %v3003_v39, %v3019_v40  ;;  %v3030_v44 = vcombine.high %v3010_v28, %v3026_v50  ;;  %v3027_v46 = vcombine.low %v3003_v39, %v3019_v40  ;;  %v3029_v42 = vcombine.low %v3010_v28, %v3026_v50  ;;  %v3261_v39 = vld [vmem:[#allocation31 + $0x28] sm:$0xff]  ;;  %v3369_v28 = vld [vmem:[#allocation31 + $0xb8] sm:$0xff]  ;;  %v3262_v50 = vld [vmem:[#allocation31 + $0x30] sm:$0xff] }
 0xb8e   : > { %v4281_v40 = vpack.c.bf16 %v3261_v39, %v3260_v26  ;;  %v3944_v33 = vld [vmem:[#allocation33] ss:$0 sm:$0xff] }
 0xb8f   : > { %3032 = vrot.lane.b32.xlu0 %v3028_v41, %s5576_s6  ;;  %3040 = vrot.lane.b32.xlu1 %v3030_v44, %s5577_s2  ;;  %v3263_v44 = vld [vmem:[#allocation31 + $0x38] sm:$0xff] }
 0xb93   : > { %3036 = vrot.lane.b32.xlu0 %v3029_v42, %s5578_s28  ;;  %v3370_v42 = vld [vmem:[#allocation31 + $0xc0] sm:$0xff] }
 0xc01   : > { %v3033_v27 = vpop.permute.xlu0 %3032  ;;  %v3041_v60 = vpop.permute.xlu1 %3040 }
 0xc02   : > { %v3044_v47 = vsel %vm2170_vm4, %v3027_v46, %v3033_v27  ;;  %v4284_v46 = vpack.c.bf16 %v3263_v44, %v3262_v50  ;;  %v3371_v27 = vld [vmem:[#allocation31 + $0xc8] sm:$0xff] }
 0xc05   : > { %v3037_v24 = vpop.permute.xlu0 %3036 }
 0xc06   : > { %v3046_v48 = vsel %vm3045_vm5, %v3044_v47, %v3037_v24  ;;  %v4263_v47 = vpack.c.bf16 %v3371_v27, %v3370_v42  ;;  %v3265_v24 = vld [vmem:[#allocation31 + $0x48] sm:$0xff] }
 0xc07   : > { %v3048_v51 = vsel %vm3047_vm6, %v3046_v48, %v3041_v60  ;;  %v3264_v60 = vld [vmem:[#allocation31 + $0x40] sm:$0xff] }
 0xc08   : > { %4116 = vmatmul.mubr.msk.f32.vlgmr.msra.gmra.mrb[0].mxu0 %vm1147_vm1, %v3048_v51  ;;  %v4287_v48 = vpack.c.bf16 %v3265_v24, %v3264_v60  ;;  %v3372_v51 = vld [vmem:[#allocation31 + $0xd0] sm:$0xff] }
 0xc09   : > { %4137 = vmatprep.mubr.msk.f32.mxu0 %vm5564_vm2, %v5565_v1  ;;  %4246 = vmatpush3.bf16.msra.mxu0 %v4245_v35  ;;  %v3940_v35 = vld [vmem:[#allocation30] ss:$0 sm:$0xff] }
 0xc0a   : > { %4247 = vmatprep.subr.bf16.mxu0 %v5563_v62 }
 0xc0d   : > { %4249 = vmatpush3.bf16.msra.mxu0 %v4248_v0 }
 0xc0e   : > { %4274 = vmatprep.subr.bf16.mxu0 %v5563_v62 }
 0xcdb   : > { %v3129_v54 = vpop.f32.mrb[0].mxu0 }
 0xcdc   : > { %v3130_v55 = vadd.f32 %v3936_v53, %v3129_v54  ;;  %v4117_v23 = vpop.f32.mrb[1].mxu0  ;;  %v3373_v53 = vld [vmem:[#allocation31 + $0xd8] sm:$0xff]  ;;  %v3266_v54 = vld [vmem:[#allocation31 + $0x50] sm:$0xff] }
 0xcdd   : > { %v3267_v23 = vld [vmem:[#allocation31 + $0x58] sm:$0xff] }
 0xcde   : > { %v6653_v57 = vadd.f32 %v3130_v55, %v6340_v52  ;;  %v3166_v52 = vld [vmem:[#allocation28 + $0x30] sm:$0xff]  ;;  %v4266_v55 = vpack.c.bf16 %v3373_v53, %v3372_v51 }
 0xcdf   : > { %v4242_v63 = vpack.c.bf16 %v3166_v52, %v3165_v34  ;;  %v4272_v34 = vpack.c.bf16 %v3377_v20, %v3376_v19  ;;  %v4296_v52 = vpack.c.bf16 %v3271_v22, %v3270_v21 }
 0xce0   : > { %v3136_v58 = vsel %vm1147_vm1, %v6653_v57, 0.0 }
 0xce1   : > { %3137 = vadd.xlane.f32.xlu1 %v3136_v58  ;;  %4243 = vmatpush3.bf16.msra.mxu1 %v4242_v63  ;;  %v3374_v58 = vld [vmem:[#allocation31 + $0xe0] sm:$0xff] }
 0xce2   : > { %4250 = vmatprep.subr.bf16.mxu1 %v5563_v62 }
 0xd6e   : > { %v3138_v59 = vpop.xlane.xlu1 %3137 }
 0xd6f   : > { %v3139_v49 = vmul.f32 0.03125, %v3138_v59  ;;  %v3375_v59 = vld [vmem:[#allocation31 + $0xe8] sm:$0xff] }
 0xd71   : > { %v3140_v14 = vsub.f32 %v6653_v57, %v3139_v49  ;;  %v4290_v49 = vpack.c.bf16 %v3267_v23, %v3266_v54 }
 0xd73   : > { %v3141_v16 = vmul.f32 %v3140_v14, %v3140_v14 }
 0xd75   : > { %v3142_v17 = vsel %vm1147_vm1, %v3141_v16, 0.0  ;;  %v3269_v16 = vld [vmem:[#allocation31 + $0x68] sm:$0xff] }
 0xd76   : > { %3143 = vadd.xlane.f32.xlu0 %v3142_v17  ;;  %v4269_v17 = vpack.c.bf16 %v3375_v59, %v3374_v58 }
 0xe03   : > { %v3144_v2 = vpop.xlane.xlu0 %3143 }
 0xe04   : > { %v3145_v3 = vmul.f32 0.03125, %v3144_v2 }
 0xe06   : > { %v3146_v4 = vadd.f32 1e-06, %v3145_v3 }
 0xe08   : > { %4727 = vrsqrt.f32 %v3146_v4 }
 0xe12   : > { %v4728_v5 = vpop.eup %4727 }
 0xe13   : > { %v3148_v43 = vmul.f32 %v4728_v5, %v3140_v14  ;;  %v3268_v14 = vld [vmem:[#allocation31 + $0x60] sm:$0xff] }
 0xe14   : > { %v4293_v18 = vpack.c.bf16 %v3269_v16, %v3268_v14 }
 0xe15   : > { %v3155_v11 = vmul.f32 %v3938_v6, %v3148_v43 }
 0xe17   : > { %v3162_v13 = vadd.f32 %v3939_v10, %v3155_v11 }
 0xe19   : > { %4127 = vmatmul.mubr.msk.f32.vlgmr.msra.gmra.mrb[0].mxu1 %vm1147_vm1, %v3162_v13  ;;  %4138 = vmatmul.mubr.msk.f32.vlgmr.msra.gmra.mrb[2].mxu0 %vm1147_vm1, %v3162_v13 }
 0xe1a   : > { %4252 = vmatpush3.bf16.msra.mxu1 %v4251_v32  ;;  %4276 = vmatpush3.bf16.msra.mxu0 %v4275_v12 }
 0xe1b   : > { %4253 = vmatprep.subr.bf16.mxu1 %v5563_v62  ;;  %4277 = vmatprep.subr.bf16.mxu0 %v5563_v62 }
 0xe1c   : > { %4172 = vmatprep.mubr.msk.f32.mxu1 %vm5564_vm2, %v5565_v1  ;;  %4207 = vmatprep.mubr.msk.f32.mxu0 %vm5564_vm2, %v5565_v1  ;;  %v3368_v1 = vld [vmem:[#allocation31 + $0xb0] sm:$0xff] }
 0xe1d   : > { %v4260_v41 = vpack.c.bf16 %v3369_v28, %v3368_v1 }
 0xe1e   : > { %4255 = vmatpush3.bf16.msra.mxu1 %v4254_v36  ;;  %4279 = vmatpush3.bf16.msra.mxu0 %v4278_v25 }
 0xe1f   : > { %4256 = vmatprep.subr.bf16.mxu1 %v5563_v62  ;;  %4280 = vmatprep.subr.bf16.mxu0 %v5563_v62 }
 0xe22   : > { %4258 = vmatpush3.bf16.msra.mxu1 %v4257_v37  ;;  %4282 = vmatpush3.bf16.msra.mxu0 %v4281_v40 }
 0xe23   : > { %4259 = vmatprep.subr.bf16.mxu1 %v5563_v62  ;;  %4283 = vmatprep.subr.bf16.mxu0 %v5563_v62 }
 0xe26   : > { %4261 = vmatpush3.bf16.msra.mxu1 %v4260_v41  ;;  %4285 = vmatpush3.bf16.msra.mxu0 %v4284_v46 }
 0xe27   : > { %4262 = vmatprep.subr.bf16.mxu1 %v5563_v62  ;;  %4286 = vmatprep.subr.bf16.mxu0 %v5563_v62 }
 0xe2a   : > { %4264 = vmatpush3.bf16.msra.mxu1 %v4263_v47  ;;  %4288 = vmatpush3.bf16.msra.mxu0 %v4287_v48 }
 0xe2b   : > { %4265 = vmatprep.subr.bf16.mxu1 %v5563_v62  ;;  %4289 = vmatprep.subr.bf16.mxu0 %v5563_v62 }
 0xe2e   : > { %4267 = vmatpush3.bf16.msra.mxu1 %v4266_v55  ;;  %4291 = vmatpush3.bf16.msra.mxu0 %v4290_v49 }
 0xe2f   : > { %4268 = vmatprep.subr.bf16.mxu1 %v5563_v62  ;;  %4292 = vmatprep.subr.bf16.mxu0 %v5563_v62 }
 0xe32   : > { %4270 = vmatpush3.bf16.msra.mxu1 %v4269_v17  ;;  %4294 = vmatpush3.bf16.msra.mxu0 %v4293_v18 }
 0xe33   : > { %4271 = vmatprep.subr.bf16.mxu1 %v5563_v62  ;;  %4295 = vmatprep.subr.bf16.mxu0 %v5563_v62 }
 0xe36   : > { %4273 = vmatpush3.bf16.msra.mxu1 %v4272_v34  ;;  %4297 = vmatpush3.bf16.msra.mxu0 %v4296_v52 }
 0xeec   : > { %v3243_v61 = vpop.f32.mrb[0].mxu1  ;;  %v3349_v63 = vpop.f32.mrb[2].mxu0 }
 0xeed   : > { %v3244_v0 = vadd.f32 %v3940_v35, %v3243_v61  ;;  %v3350_v2 = vadd.f32 %v3942_v56, %v3349_v63  ;;  %v4128_v3 = vpop.f32.mrb[1].mxu1  ;;  %v4139_v4 = vpop.f32.mrb[3].mxu0 }
 0xeef   : > { %v3248_v5 = vmul.f32 %v3244_v0, %v3244_v0  ;;  %v3354_v6 = vmul.f32 %v3350_v2, %v3350_v2  ;;  %v3247_v13 = vmul.f32 0.5, %v3244_v0  ;;  %v3353_v29 = vmul.f32 0.5, %v3350_v2 }
 0xef1   : > { %v3249_v7 = vmul.f32 %v3248_v5, %v3244_v0  ;;  %v3355_v43 = vmul.f32 %v3354_v6, %v3350_v2 }
 0xef3   : > { %v3250_v45 = vmul.f32 0.044715, %v3249_v7  ;;  %v3356_v8 = vmul.f32 0.044715, %v3355_v43 }
 0xef5   : > { %v3251_v9 = vadd.f32 %v3250_v45, %v3244_v0  ;;  %v3357_v10 = vadd.f32 %v3356_v8, %v3350_v2 }
 0xef7   : > { %v3252_v62 = vmul.f32 0.7978846, %v3251_v9  ;;  %v3358_v11 = vmul.f32 0.7978846, %v3357_v10 }
 0xef9   : > { %4729 = vtanh.f32 %v3252_v62 }
 0xefa   : > { %4731 = vtanh.f32 %v3358_v11 }
 0xf03   : > { %v4730_v32 = vpop.eup %4729 }
 0xf04   : > { %v4732_v12 = vpop.eup %4731  ;;  %v3254_v15 = vadd.f32 1.0, %v4730_v32 }
 0xf05   : > { %v3360_v30 = vadd.f32 1.0, %v4732_v12 }
 0xf06   : > { %v3255_v36 = vmul.f32 %v3254_v15, %v3247_v13 }
 0xf07   : > { %v3361_v38 = vmul.f32 %v3360_v30, %v3353_v29 }
 0xf08   : > { %4208 = vmatmul.mubr.f32.vlgmr.msra.gmra.mrb[4].mxu0 %v3255_v36 }
 0xf09   : > { %4173 = vmatmul.mubr.f32.vlgmr.msra.gmra.mrb[2].mxu1 %v3361_v38 }
 0xfdb   : > { %v3514_v25 = vpop.f32.mrb[4].mxu0 }
 0xfdc   : > { %v3444_v31 = vpop.f32.mrb[2].mxu1  ;;  %v4209_v26 = vpop.f32.mrb[5].mxu0 }
 0xfdd   : > { %v3515_v37 = vadd.f32 %v3514_v25, %v3444_v31  ;;  %v4174_v39 = vpop.f32.mrb[3].mxu1 }
 0xfdf   : > { %v3525_v40 = vadd.f32 %v3944_v33, %v3515_v37 }
 0xfe1   : > { %v3526_v1 = vadd.f32 %v3525_v40, %v6653_v57 }
 0xfe3   : > { %3527 = vst.msk [vmem:[%s6324_s5] sm:$0xff] %vm1147_vm1, %v3526_v1 }
 0xfe4   : > { %5284 = shalt.err (!%p5281_p13)
}
 0xfe5   : > { %s5285_s30 = scalar_lea.hbm %s6690_s8, 128  ;;  %s5289_s2 = scalar_lea.hbm %s6935_s26, 512 }
 0xfe6   : > { %p5286_p1 = scmp.ne.s32.totalorder %s6690_s8, %s5285_s30  ;;  %p5290_p7 = scmp.lt.u32.totalorder %s6690_s8, %s6935_s26 }
 0xfe7   : > { %p5291_p12 = scmp.lt.u32.totalorder %s5289_s2, %s5285_s30  ;;  %p5293_p9 = scmp.lt.u32.totalorder %s5285_s30, %s6690_s8 }
 0xfe8   : > { %p5287_p8 = pnand %p5286_p1, %p6936_p11 }
 0xfe9   : > { %p5292_p10 = por %p5291_p12, %p5290_p7 }
 0xfea   : > { %p5288_p5 = pneg %p5287_p8 }
 0xfeb   : > { %p5294_p0 = por %p5293_p9, %p5292_p10 }
 0xfed   : > { %p5295_p2 = pnand %p5294_p0, %p5288_p5 }
 0xfef   : > { %5298 = shalt.err (!%p5295_p2)
}
 0xff0   : > { %4368 = dma.vmem_to_hbm [thread:$0]  (%p6936_p11), %s6692_s13, 128, %s6690_s8, %s3529_s23  }
 0xff1 PF: > { %s6937_s27 = sld [smem:[#allocation56_spill]]  ;;  %s6938_s14 = sld [smem:[#allocation49_spill]] }
 0xff2   : > { %p6939_p3 = scmp.ne.s32.totalorder %s6887_s7, 0 }
 0xff7   : > { %p4466_p4 = scmp.ge.s32.totalorder %s6937_s27, 2  ;;  %s3556_s19 = sand.u32 1, %s6938_s14  }
 0xff8   : > { %s3557_s18 = scalar_lea.sflag [#allocation6], %s3556_s19 }
 0xff9   : > { %p4430_p6 = pnand %p4466_p4, %p6939_p3 }
 0xffb   : > { %5440 = dma.done.wait (!%p4430_p6), %s3557_s18, 128  }
 0xffc   : > { %5442 = vsyncadd (!%p4430_p6), %s3557_s18, 4294967168  ;;  %s46_s3 = sadd.s32 1, %s6937_s27   ;;  %s6940_s0 = sld [smem:[#allocation47_spill]] }
 0xffd   : > { %p43_p13 = scmp.ge.s32.totalorder %s46_s3, 6   ;;  %s6941_s30 = sld [smem:[#allocation48_spill]] }
 0xffe   : > { %s6942_s21 = sld [smem:[#allocation50_spill]]  ;;  %s6943_s1 = sld [smem:[#allocation51_spill]] }
 0xfff   : > { %s6944_s2 = sld [smem:[#allocation54_spill]]  ;;  %s6945_s23 = sld [smem:[#allocation55_spill]] }
0x1000   : > { %s6946_s13 = smov %s6956_s20  ;;  %s6947_s20 = smov %s6157_s9 }
0x1001   : > { %s6948_s22 = smov %s6160_s10  ;;  %s6949_s24 = smov %s6952_s25 }
0x1002   : > { %s6950_s25 = smov %s6946_s13  ;;  %45 = sbr.rel (!%p43_p13) target bundleno = 39 (0x27), region = 248 }
0x1009   :  { %3562 = vsyncpa [#allocation5], 1 }
0x100a   :  { %3564 = vsyncpa [#allocation5 + $0x1], 1 }
0x100b   :  { %3565 = vsyncpa [#allocation8], 1 }
0x100c   :  { %3567 = vsyncpa [#allocation8 + $0x1], 1 }
0x100d   :  { %3568 = vsyncpa [#allocation11], 1 }
0x100e   :  { %3569 = vsyncpa [#allocation14], 1 }
0x100f   :  { %3570 = vsyncpa [#allocation17], 1 }
0x1010   :  { %3571 = vsyncpa [#allocation20], 1 }
0x1011   :  { %3572 = vsyncpa [#allocation23], 1 }
0x1012   :  { %3573 = vsyncpa [#allocation26], 1 }
0x1013   :  { %3574 = vsyncpa [#allocation29], 1 }
0x1014   :  { %3575 = vsyncpa [#allocation32], 1 }
0x1015   :  { %3576 = vsyncpa [#allocation6], 1 }
0x1016   :  { %3578 = vsyncpa [#allocation6 + $0x1], 1 }

</bundles_post_ra>
